<compile_context>
chip_gen: v6e
topology: v6e:2x2x1
jax: 0.10.0
libtpu: 0.0.40
codegen_flags: <defaults>
</compile_context>

<pallas_src>
import functools
import numpy as np
import jax
import jax.numpy as jnp
from jax import lax
from jax.experimental import pallas as pl
from jax.experimental.pallas import tpu as pltpu


# ----------------------------------------------------------------------------
# Fused Pallas kernel: LSTM layer 1 -> LSTM layer 2 -> fc1 -> Mish -> fc2.
# Everything is resident in VMEM (total footprint ~100 KB at these shapes).
# ----------------------------------------------------------------------------
def _lstm_net_kernel(x_ref,                       # (T*B, D)  time-major input slab
                     wih1_ref, whh1_ref, bl1_ref,  # layer 1: (D,4H), (H,4H), (1,4H)
                     wih2_ref, whh2_ref, bl2_ref,  # layer 2: (H,4H), (H,4H), (1,4H)
                     w1_ref, b1_ref,               # fc1: (H,F), (1,F)
                     w2_ref, b2_ref,               # fc2: (F,O), (1,O)
                     out_ref,                      # (T*B, O) time-major output slab
                     proj_scr,                     # VMEM (T*B, 4H) scratch (reused per layer)
                     hist1_scr,                    # VMEM (T*B, H) layer-1 h history
                     hist2_scr,                    # VMEM (T*B, H) layer-2 h history
                     *, seq_len, batch):
    H = whh1_ref.shape[0]

    def cell(gates, c_prev):
        # PyTorch gate order: [i, f, g, o] along the last axis.
        i_g = jax.nn.sigmoid(gates[:, 0 * H:1 * H])
        f_g = jax.nn.sigmoid(gates[:, 1 * H:2 * H])
        g_g = jnp.tanh(gates[:, 2 * H:3 * H])
        o_g = jax.nn.sigmoid(gates[:, 3 * H:4 * H])
        c_new = f_g * c_prev + i_g * g_g
        h_new = o_g * jnp.tanh(c_new)
        return h_new, c_new

    zeros = jnp.zeros((batch, H), jnp.float32)

    # ---------------- Layer 1 ----------------
    # Hoist the non-recurrent projection (and the summed bias) out of the loop:
    # one (T*B, D) x (D, 4H) MXU matmul instead of T tiny ones.
    proj_scr[...] = (jnp.dot(x_ref[...], wih1_ref[...],
                             preferred_element_type=jnp.float32) + bl1_ref[...])
    whh1 = whh1_ref[...]

    def step1(t, carry):
        h_prev, c_prev = carry
        gates = proj_scr[pl.ds(t * batch, batch), :] + jnp.dot(
            h_prev, whh1, preferred_element_type=jnp.float32)
        h_new, c_new = cell(gates, c_prev)
        hist1_scr[pl.ds(t * batch, batch), :] = h_new
        return (h_new, c_new)

    lax.fori_loop(0, seq_len, step1, (zeros, zeros), unroll=True)

    # ---------------- Layer 2 ----------------
    # Layer-1 history is already fully in VMEM; project it in one matmul.
    proj_scr[...] = (jnp.dot(hist1_scr[...], wih2_ref[...],
                             preferred_element_type=jnp.float32) + bl2_ref[...])
    whh2 = whh2_ref[...]

    def step2(t, carry):
        h_prev, c_prev = carry
        gates = proj_scr[pl.ds(t * batch, batch), :] + jnp.dot(
            h_prev, whh2, preferred_element_type=jnp.float32)
        h_new, c_new = cell(gates, c_prev)
        hist2_scr[pl.ds(t * batch, batch), :] = h_new
        return (h_new, c_new)

    lax.fori_loop(0, seq_len, step2, (zeros, zeros), unroll=True)

    # ---------------- fc1 -> Mish -> fc2 (row-pointwise, time-major slab) ----------------
    h = hist2_scr[...]                                                    # (T*B, H)
    z = jnp.dot(h, w1_ref[...], preferred_element_type=jnp.float32) + b1_ref[...]
    z = z * jnp.tanh(jnp.logaddexp(z, 0.0))                               # Mish(x) = x*tanh(softplus(x))
    y = jnp.dot(z, w2_ref[...], preferred_element_type=jnp.float32) + b2_ref[...]
    out_ref[...] = y.astype(out_ref.dtype)


# ----------------------------------------------------------------------------
# Full LSTM_net forward (inference): one fused Pallas call + tiny reshape glue.
# ----------------------------------------------------------------------------
def lstm_net_forward(x_btd, params):
    """x_btd: (B, T, D) batch_first, like PyTorch input.  Returns (B, T, n_outputs)."""
    B, T, D = x_btd.shape
    l1, l2 = params["lstm"]
    H = l1["whh_t"].shape[0]
    O = params["w2_t"].shape[1]

    # Time-major (T*B, D) slab so per-step rows [t*B : (t+1)*B] are contiguous.
    x_tb = jnp.transpose(x_btd, (1, 0, 2)).reshape(T * B, D)

    vmem = pl.BlockSpec(memory_space=pltpu.MemorySpace.VMEM)
    y_tb = pl.pallas_call(
        functools.partial(_lstm_net_kernel, seq_len=T, batch=B),
        out_shape=jax.ShapeDtypeStruct((T * B, O), jnp.float32),
        in_specs=[vmem] * 11,
        out_specs=vmem,
        scratch_shapes=[
            pltpu.VMEM((T * B, 4 * H), jnp.float32),   # input-projection slab (reused)
            pltpu.VMEM((T * B, H), jnp.float32),       # layer-1 h history
            pltpu.VMEM((T * B, H), jnp.float32),       # layer-2 h history
        ],
    )(x_tb,
      l1["wih_t"], l1["whh_t"], l1["b"],
      l2["wih_t"], l2["whh_t"], l2["b"],
      params["w1_t"], params["b1"], params["w2_t"], params["b2"])

    # Tiny (T*B, O) reorder back to PyTorch batch_first layout.
    return jnp.transpose(y_tb.reshape(T, B, O), (1, 0, 2))


# ----------------------------------------------------------------------------
# Pure-JAX reference (sanity check only).
# ----------------------------------------------------------------------------
def lstm_net_ref(x_btd, params):
    B, T, D = x_btd.shape
    h = jnp.transpose(x_btd, (1, 0, 2))            # (T, B, D)
    for layer in params["lstm"]:
        H = layer["whh_t"].shape[0]

        def step(carry, x_t):
            h_p, c_p = carry
            gates = x_t @ layer["wih_t"] + h_p @ layer["whh_t"] + layer["b"][0]
            i_g = jax.nn.sigmoid(gates[:, 0 * H:1 * H])
            f_g = jax.nn.sigmoid(gates[:, 1 * H:2 * H])
            g_g = jnp.tanh(gates[:, 2 * H:3 * H])
            o_g = jax.nn.sigmoid(gates[:, 3 * H:4 * H])
            c_n = f_g * c_p + i_g * g_g
            h_n = o_g * jnp.tanh(c_n)
            return (h_n, c_n), h_n

        init = (jnp.zeros((B, H), jnp.float32), jnp.zeros((B, H), jnp.float32))
        _, h = lax.scan(step, init, h)
    H = h.shape[-1]
    h_bt = jnp.transpose(h, (1, 0, 2)).reshape(B * T, H)
    z = h_bt @ params["w1_t"] + params["b1"][0]
    z = z * jnp.tanh(jnp.logaddexp(z, 0.0))
    y = z @ params["w2_t"] + params["b2"][0]
    return y.reshape(B, T, params["w2_t"].shape[1])


# ----------------------------------------------------------------------------
# Deterministic parameter construction (shapes follow nn.LSTM / nn.Linear).
# ----------------------------------------------------------------------------
def init_params(key, input_size, hidden_size, num_layers, fc_size, output_size):
    params = {"lstm": []}
    keys = jax.random.split(key, num_layers * 4 + 4)
    k = 0
    for layer in range(num_layers):
        in_dim = input_size if layer == 0 else hidden_size
        std_ih = (2.0 / (4 * hidden_size + in_dim)) ** 0.5        # xavier-normal-ish
        std_hh = (2.0 / (4 * hidden_size + hidden_size)) ** 0.5
        wih = std_ih * jax.random.normal(keys[k], (4 * hidden_size, in_dim), jnp.float32); k += 1
        whh = std_hh * jax.random.normal(keys[k], (4 * hidden_size, hidden_size), jnp.float32); k += 1
        b_ih = 0.1 * jax.random.normal(keys[k], (4 * hidden_size,), jnp.float32); k += 1
        b_hh = 0.1 * jax.random.normal(keys[k], (4 * hidden_size,), jnp.float32); k += 1
        params["lstm"].append({
            "wih_t": wih.T,                                        # (D, 4H)
            "whh_t": whh.T,                                        # (H, 4H)
            "b": (b_ih + b_hh)[None, :],                           # (1, 4H)
        })
    w1 = (2.0 / hidden_size) ** 0.5 * jax.random.normal(keys[k], (fc_size, hidden_size), jnp.float32); k += 1
    b1 = 0.1 * jax.random.normal(keys[k], (fc_size,), jnp.float32); k += 1
    w2 = (2.0 / fc_size) ** 0.5 * jax.random.normal(keys[k], (output_size, fc_size), jnp.float32); k += 1
    b2 = 0.1 * jax.random.normal(keys[k], (output_size,), jnp.float32); k += 1
    params["w1_t"] = w1.T                                          # (H, F)
    params["b1"] = b1[None, :]                                     # (1, F)
    params["w2_t"] = w2.T                                          # (F, O)
    params["b2"] = b2[None, :]                                     # (1, O)
    return params


if __name__ == "__main__":
    # Small shapes consistent with the module's forward pass.
    B, T = 2, 8
    INPUT_SIZE, HIDDEN_SIZE, NUM_LAYERS = 16, 32, 2
    FC_SIZE, OUTPUT_SIZE = 64, 16

    key = jax.random.PRNGKey(0)
    k_x, k_p = jax.random.split(key)
    x = jax.random.normal(k_x, (B, T, INPUT_SIZE), jnp.float32)    # batch_first input
    params = init_params(k_p, INPUT_SIZE, HIDDEN_SIZE, NUM_LAYERS, FC_SIZE, OUTPUT_SIZE)

    out = jax.jit(lstm_net_forward)(x, params)
    out = jax.block_until_ready(out)
    assert out.shape == (B, T, OUTPUT_SIZE), out.shape

    ref = jax.block_until_ready(lstm_net_ref(x, params))
    np.testing.assert_allclose(np.asarray(out), np.asarray(ref), rtol=1e-3, atol=1e-3)

    print("KERNEL_OK")
</pallas_src>

<mosaic_0001>
module attributes {stable_mosaic.version = 11 : i64} {
  func.func @_lstm_net_kernel(%arg0: memref<16x16xf32, #tpu.memory_space<vmem>>, %arg1: memref<16x128xf32, #tpu.memory_space<vmem>>, %arg2: memref<32x128xf32, #tpu.memory_space<vmem>>, %arg3: memref<1x128xf32, #tpu.memory_space<vmem>>, %arg4: memref<32x128xf32, #tpu.memory_space<vmem>>, %arg5: memref<32x128xf32, #tpu.memory_space<vmem>>, %arg6: memref<1x128xf32, #tpu.memory_space<vmem>>, %arg7: memref<32x64xf32, #tpu.memory_space<vmem>>, %arg8: memref<1x64xf32, #tpu.memory_space<vmem>>, %arg9: memref<64x16xf32, #tpu.memory_space<vmem>>, %arg10: memref<1x16xf32, #tpu.memory_space<vmem>>, %arg11: memref<16x16xf32, #tpu.memory_space<vmem>>, %arg12: memref<16x128xf32, #tpu.memory_space<vmem>>, %arg13: memref<16x32xf32, #tpu.memory_space<vmem>>, %arg14: memref<16x32xf32, #tpu.memory_space<vmem>>) attributes {dimension_semantics = [], scalar_prefetch = 0 : i64, scratch_operands = 3 : i64, tpu.core_type = #tpu.core_type<tc>} {
    %cst = arith.constant 0.000000e+00 : f32
    %0 = vector.broadcast %cst : f32 to vector<2x32xf32>
    %c0 = arith.constant 0 : index
    %c0_0 = arith.constant 0 : index
    %1 = vector.load %arg0[%c0, %c0_0] : memref<16x16xf32, #tpu.memory_space<vmem>>, vector<16x16xf32>
    %c0_1 = arith.constant 0 : index
    %c0_2 = arith.constant 0 : index
    %2 = vector.load %arg1[%c0_1, %c0_2] : memref<16x128xf32, #tpu.memory_space<vmem>>, vector<16x128xf32>
    %cst_3 = arith.constant dense<0.000000e+00> : vector<16x128xf32>
    %3 = tpu.matmul %1, %2, %cst_3 {dimension_numbers = #tpu.dot_dimension_numbers<[1], [0], [0], [1], [0, 0, 1, 1], [], []>} : vector<16x16xf32>, vector<16x128xf32>, vector<16x128xf32> -> vector<16x128xf32>
    %c0_4 = arith.constant 0 : index
    %c0_5 = arith.constant 0 : index
    %4 = vector.load %arg3[%c0_4, %c0_5] : memref<1x128xf32, #tpu.memory_space<vmem>>, vector<1x128xf32>
    %5 = vector.broadcast %4 : vector<1x128xf32> to vector<16x128xf32>
    %6 = arith.addf %3, %5 : vector<16x128xf32>
    %c0_6 = arith.constant 0 : index
    %c0_7 = arith.constant 0 : index
    %7 = vector.load %arg12[%c0_6, %c0_7] : memref<16x128xf32, #tpu.memory_space<vmem>>, vector<16x128xf32>
    tpu.vector_store %arg12[%c0_6, %c0_7], %6 {strides = array<i32>} : memref<16x128xf32, #tpu.memory_space<vmem>>, vector<16x128xf32>,
    %c0_8 = arith.constant 0 : index
    %c0_9 = arith.constant 0 : index
    %8 = vector.load %arg2[%c0_8, %c0_9] : memref<32x128xf32, #tpu.memory_space<vmem>>, vector<32x128xf32>
    %c0_i32 = arith.constant 0 : i32
    %c2_i32 = arith.constant 2 : i32
    %9 = arith.muli %c0_i32, %c2_i32 : i32
    %10 = arith.index_cast %9 : i32 to index
    %c0_10 = arith.constant 0 : index
    %11 = vector.load %arg12[%10, %c0_10] : memref<16x128xf32, #tpu.memory_space<vmem>>, vector<2x128xf32>
    %cst_11 = arith.constant dense<0.000000e+00> : vector<2x128xf32>
    %12 = tpu.matmul %0, %8, %cst_11 {dimension_numbers = #tpu.dot_dimension_numbers<[1], [0], [0], [1], [0, 0, 1, 1], [], []>} : vector<2x32xf32>, vector<32x128xf32>, vector<2x128xf32> -> vector<2x128xf32>
    %13 = arith.addf %11, %12 : vector<2x128xf32>
    %14 = vector.extract_strided_slice %13 {offsets = [0, 0], sizes = [2, 32], strides = [1, 1]} : vector<2x128xf32> to vector<2x32xf32>
    %15 = arith.negf %14 : vector<2x32xf32>
    %16 = math.exp %15 : vector<2x32xf32>
    %cst_12 = arith.constant 1.000000e+00 : f32
    %17 = vector.broadcast %cst_12 : f32 to vector<2x32xf32>
    %18 = arith.addf %17, %16 : vector<2x32xf32>
    %19 = arith.divf %17, %18 : vector<2x32xf32>
    %20 = vector.extract_strided_slice %13 {offsets = [0, 32], sizes = [2, 32], strides = [1, 1]} : vector<2x128xf32> to vector<2x32xf32>
    %21 = arith.negf %20 : vector<2x32xf32>
    %22 = math.exp %21 : vector<2x32xf32>
    %cst_13 = arith.constant 1.000000e+00 : f32
    %23 = vector.broadcast %cst_13 : f32 to vector<2x32xf32>
    %24 = arith.addf %23, %22 : vector<2x32xf32>
    %25 = arith.divf %23, %24 : vector<2x32xf32>
    %26 = vector.extract_strided_slice %13 {offsets = [0, 64], sizes = [2, 32], strides = [1, 1]} : vector<2x128xf32> to vector<2x32xf32>
    %27 = math.tanh %26 : vector<2x32xf32>
    %28 = vector.extract_strided_slice %13 {offsets = [0, 96], sizes = [2, 32], strides = [1, 1]} : vector<2x128xf32> to vector<2x32xf32>
    %29 = arith.negf %28 : vector<2x32xf32>
    %30 = math.exp %29 : vector<2x32xf32>
    %cst_14 = arith.constant 1.000000e+00 : f32
    %31 = vector.broadcast %cst_14 : f32 to vector<2x32xf32>
    %32 = arith.addf %31, %30 : vector<2x32xf32>
    %33 = arith.divf %31, %32 : vector<2x32xf32>
    %34 = arith.mulf %25, %0 : vector<2x32xf32>
    %35 = arith.mulf %19, %27 : vector<2x32xf32>
    %36 = arith.addf %34, %35 : vector<2x32xf32>
    %37 = math.tanh %36 : vector<2x32xf32>
    %38 = arith.mulf %33, %37 : vector<2x32xf32>
    %c2_i32_15 = arith.constant 2 : i32
    %39 = arith.muli %c0_i32, %c2_i32_15 : i32
    %40 = arith.index_cast %39 : i32 to index
    %c0_16 = arith.constant 0 : index
    %41 = vector.load %arg13[%40, %c0_16] : memref<16x32xf32, #tpu.memory_space<vmem>>, vector<2x32xf32>
    tpu.vector_store %arg13[%40, %c0_16], %38 {strides = array<i32>} : memref<16x32xf32, #tpu.memory_space<vmem>>, vector<2x32xf32>,
    %c1_i32 = arith.constant 1 : i32
    %c2_i32_17 = arith.constant 2 : i32
    %42 = arith.muli %c1_i32, %c2_i32_17 : i32
    %43 = arith.index_cast %42 : i32 to index
    %c0_18 = arith.constant 0 : index
    %44 = vector.load %arg12[%43, %c0_18] : memref<16x128xf32, #tpu.memory_space<vmem>>, vector<2x128xf32>
    %cst_19 = arith.constant dense<0.000000e+00> : vector<2x128xf32>
    %45 = tpu.matmul %38, %8, %cst_19 {dimension_numbers = #tpu.dot_dimension_numbers<[1], [0], [0], [1], [0, 0, 1, 1], [], []>} : vector<2x32xf32>, vector<32x128xf32>, vector<2x128xf32> -> vector<2x128xf32>
    %46 = arith.addf %44, %45 : vector<2x128xf32>
    %47 = vector.extract_strided_slice %46 {offsets = [0, 0], sizes = [2, 32], strides = [1, 1]} : vector<2x128xf32> to vector<2x32xf32>
    %48 = arith.negf %47 : vector<2x32xf32>
    %49 = math.exp %48 : vector<2x32xf32>
    %cst_20 = arith.constant 1.000000e+00 : f32
    %50 = vector.broadcast %cst_20 : f32 to vector<2x32xf32>
    %51 = arith.addf %50, %49 : vector<2x32xf32>
    %52 = arith.divf %50, %51 : vector<2x32xf32>
    %53 = vector.extract_strided_slice %46 {offsets = [0, 32], sizes = [2, 32], strides = [1, 1]} : vector<2x128xf32> to vector<2x32xf32>
    %54 = arith.negf %53 : vector<2x32xf32>
    %55 = math.exp %54 : vector<2x32xf32>
    %cst_21 = arith.constant 1.000000e+00 : f32
    %56 = vector.broadcast %cst_21 : f32 to vector<2x32xf32>
    %57 = arith.addf %56, %55 : vector<2x32xf32>
    %58 = arith.divf %56, %57 : vector<2x32xf32>
    %59 = vector.extract_strided_slice %46 {offsets = [0, 64], sizes = [2, 32], strides = [1, 1]} : vector<2x128xf32> to vector<2x32xf32>
    %60 = math.tanh %59 : vector<2x32xf32>
    %61 = vector.extract_strided_slice %46 {offsets = [0, 96], sizes = [2, 32], strides = [1, 1]} : vector<2x128xf32> to vector<2x32xf32>
    %62 = arith.negf %61 : vector<2x32xf32>
    %63 = math.exp %62 : vector<2x32xf32>
    %cst_22 = arith.constant 1.000000e+00 : f32
    %64 = vector.broadcast %cst_22 : f32 to vector<2x32xf32>
    %65 = arith.addf %64, %63 : vector<2x32xf32>
    %66 = arith.divf %64, %65 : vector<2x32xf32>
    %67 = arith.mulf %58, %36 : vector<2x32xf32>
    %68 = arith.mulf %52, %60 : vector<2x32xf32>
    %69 = arith.addf %67, %68 : vector<2x32xf32>
    %70 = math.tanh %69 : vector<2x32xf32>
    %71 = arith.mulf %66, %70 : vector<2x32xf32>
    %c2_i32_23 = arith.constant 2 : i32
    %72 = arith.muli %c1_i32, %c2_i32_23 : i32
    %73 = arith.index_cast %72 : i32 to index
    %c0_24 = arith.constant 0 : index
    %74 = vector.load %arg13[%73, %c0_24] : memref<16x32xf32, #tpu.memory_space<vmem>>, vector<2x32xf32>
    tpu.vector_store %arg13[%73, %c0_24], %71 {strides = array<i32>} : memref<16x32xf32, #tpu.memory_space<vmem>>, vector<2x32xf32>,
    %c2_i32_25 = arith.constant 2 : i32
    %c2_i32_26 = arith.constant 2 : i32
    %75 = arith.muli %c2_i32_25, %c2_i32_26 : i32
    %76 = arith.index_cast %75 : i32 to index
    %c0_27 = arith.constant 0 : index
    %77 = vector.load %arg12[%76, %c0_27] : memref<16x128xf32, #tpu.memory_space<vmem>>, vector<2x128xf32>
    %cst_28 = arith.constant dense<0.000000e+00> : vector<2x128xf32>
    %78 = tpu.matmul %71, %8, %cst_28 {dimension_numbers = #tpu.dot_dimension_numbers<[1], [0], [0], [1], [0, 0, 1, 1], [], []>} : vector<2x32xf32>, vector<32x128xf32>, vector<2x128xf32> -> vector<2x128xf32>
    %79 = arith.addf %77, %78 : vector<2x128xf32>
    %80 = vector.extract_strided_slice %79 {offsets = [0, 0], sizes = [2, 32], strides = [1, 1]} : vector<2x128xf32> to vector<2x32xf32>
    %81 = arith.negf %80 : vector<2x32xf32>
    %82 = math.exp %81 : vector<2x32xf32>
    %cst_29 = arith.constant 1.000000e+00 : f32
    %83 = vector.broadcast %cst_29 : f32 to vector<2x32xf32>
    %84 = arith.addf %83, %82 : vector<2x32xf32>
    %85 = arith.divf %83, %84 : vector<2x32xf32>
    %86 = vector.extract_strided_slice %79 {offsets = [0, 32], sizes = [2, 32], strides = [1, 1]} : vector<2x128xf32> to vector<2x32xf32>
    %87 = arith.negf %86 : vector<2x32xf32>
    %88 = math.exp %87 : vector<2x32xf32>
    %cst_30 = arith.constant 1.000000e+00 : f32
    %89 = vector.broadcast %cst_30 : f32 to vector<2x32xf32>
    %90 = arith.addf %89, %88 : vector<2x32xf32>
    %91 = arith.divf %89, %90 : vector<2x32xf32>
    %92 = vector.extract_strided_slice %79 {offsets = [0, 64], sizes = [2, 32], strides = [1, 1]} : vector<2x128xf32> to vector<2x32xf32>
    %93 = math.tanh %92 : vector<2x32xf32>
    %94 = vector.extract_strided_slice %79 {offsets = [0, 96], sizes = [2, 32], strides = [1, 1]} : vector<2x128xf32> to vector<2x32xf32>
    %95 = arith.negf %94 : vector<2x32xf32>
    %96 = math.exp %95 : vector<2x32xf32>
    %cst_31 = arith.constant 1.000000e+00 : f32
    %97 = vector.broadcast %cst_31 : f32 to vector<2x32xf32>
    %98 = arith.addf %97, %96 : vector<2x32xf32>
    %99 = arith.divf %97, %98 : vector<2x32xf32>
    %100 = arith.mulf %91, %69 : vector<2x32xf32>
    %101 = arith.mulf %85, %93 : vector<2x32xf32>
    %102 = arith.addf %100, %101 : vector<2x32xf32>
    %103 = math.tanh %102 : vector<2x32xf32>
    %104 = arith.mulf %99, %103 : vector<2x32xf32>
    %c2_i32_32 = arith.constant 2 : i32
    %105 = arith.muli %c2_i32_25, %c2_i32_32 : i32
    %106 = arith.index_cast %105 : i32 to index
    %c0_33 = arith.constant 0 : index
    %107 = vector.load %arg13[%106, %c0_33] : memref<16x32xf32, #tpu.memory_space<vmem>>, vector<2x32xf32>
    tpu.vector_store %arg13[%106, %c0_33], %104 {strides = array<i32>} : memref<16x32xf32, #tpu.memory_space<vmem>>, vector<2x32xf32>,
    %c3_i32 = arith.constant 3 : i32
    %c2_i32_34 = arith.constant 2 : i32
    %108 = arith.muli %c3_i32, %c2_i32_34 : i32
    %109 = arith.index_cast %108 : i32 to index
    %c0_35 = arith.constant 0 : index
    %110 = vector.load %arg12[%109, %c0_35] : memref<16x128xf32, #tpu.memory_space<vmem>>, vector<2x128xf32>
    %cst_36 = arith.constant dense<0.000000e+00> : vector<2x128xf32>
    %111 = tpu.matmul %104, %8, %cst_36 {dimension_numbers = #tpu.dot_dimension_numbers<[1], [0], [0], [1], [0, 0, 1, 1], [], []>} : vector<2x32xf32>, vector<32x128xf32>, vector<2x128xf32> -> vector<2x128xf32>
    %112 = arith.addf %110, %111 : vector<2x128xf32>
    %113 = vector.extract_strided_slice %112 {offsets = [0, 0], sizes = [2, 32], strides = [1, 1]} : vector<2x128xf32> to vector<2x32xf32>
    %114 = arith.negf %113 : vector<2x32xf32>
    %115 = math.exp %114 : vector<2x32xf32>
    %cst_37 = arith.constant 1.000000e+00 : f32
    %116 = vector.broadcast %cst_37 : f32 to vector<2x32xf32>
    %117 = arith.addf %116, %115 : vector<2x32xf32>
    %118 = arith.divf %116, %117 : vector<2x32xf32>
    %119 = vector.extract_strided_slice %112 {offsets = [0, 32], sizes = [2, 32], strides = [1, 1]} : vector<2x128xf32> to vector<2x32xf32>
    %120 = arith.negf %119 : vector<2x32xf32>
    %121 = math.exp %120 : vector<2x32xf32>
    %cst_38 = arith.constant 1.000000e+00 : f32
    %122 = vector.broadcast %cst_38 : f32 to vector<2x32xf32>
    %123 = arith.addf %122, %121 : vector<2x32xf32>
    %124 = arith.divf %122, %123 : vector<2x32xf32>
    %125 = vector.extract_strided_slice %112 {offsets = [0, 64], sizes = [2, 32], strides = [1, 1]} : vector<2x128xf32> to vector<2x32xf32>
    %126 = math.tanh %125 : vector<2x32xf32>
    %127 = vector.extract_strided_slice %112 {offsets = [0, 96], sizes = [2, 32], strides = [1, 1]} : vector<2x128xf32> to vector<2x32xf32>
    %128 = arith.negf %127 : vector<2x32xf32>
    %129 = math.exp %128 : vector<2x32xf32>
    %cst_39 = arith.constant 1.000000e+00 : f32
    %130 = vector.broadcast %cst_39 : f32 to vector<2x32xf32>
    %131 = arith.addf %130, %129 : vector<2x32xf32>
    %132 = arith.divf %130, %131 : vector<2x32xf32>
    %133 = arith.mulf %124, %102 : vector<2x32xf32>
    %134 = arith.mulf %118, %126 : vector<2x32xf32>
    %135 = arith.addf %133, %134 : vector<2x32xf32>
    %136 = math.tanh %135 : vector<2x32xf32>
    %137 = arith.mulf %132, %136 : vector<2x32xf32>
    %c2_i32_40 = arith.constant 2 : i32
    %138 = arith.muli %c3_i32, %c2_i32_40 : i32
    %139 = arith.index_cast %138 : i32 to index
    %c0_41 = arith.constant 0 : index
    %140 = vector.load %arg13[%139, %c0_41] : memref<16x32xf32, #tpu.memory_space<vmem>>, vector<2x32xf32>
    tpu.vector_store %arg13[%139, %c0_41], %137 {strides = array<i32>} : memref<16x32xf32, #tpu.memory_space<vmem>>, vector<2x32xf32>,
    %c4_i32 = arith.constant 4 : i32
    %c2_i32_42 = arith.constant 2 : i32
    %141 = arith.muli %c4_i32, %c2_i32_42 : i32
    %142 = arith.index_cast %141 : i32 to index
    %c0_43 = arith.constant 0 : index
    %143 = vector.load %arg12[%142, %c0_43] : memref<16x128xf32, #tpu.memory_space<vmem>>, vector<2x128xf32>
    %cst_44 = arith.constant dense<0.000000e+00> : vector<2x128xf32>
    %144 = tpu.matmul %137, %8, %cst_44 {dimension_numbers = #tpu.dot_dimension_numbers<[1], [0], [0], [1], [0, 0, 1, 1], [], []>} : vector<2x32xf32>, vector<32x128xf32>, vector<2x128xf32> -> vector<2x128xf32>
    %145 = arith.addf %143, %144 : vector<2x128xf32>
    %146 = vector.extract_strided_slice %145 {offsets = [0, 0], sizes = [2, 32], strides = [1, 1]} : vector<2x128xf32> to vector<2x32xf32>
    %147 = arith.negf %146 : vector<2x32xf32>
    %148 = math.exp %147 : vector<2x32xf32>
    %cst_45 = arith.constant 1.000000e+00 : f32
    %149 = vector.broadcast %cst_45 : f32 to vector<2x32xf32>
    %150 = arith.addf %149, %148 : vector<2x32xf32>
    %151 = arith.divf %149, %150 : vector<2x32xf32>
    %152 = vector.extract_strided_slice %145 {offsets = [0, 32], sizes = [2, 32], strides = [1, 1]} : vector<2x128xf32> to vector<2x32xf32>
    %153 = arith.negf %152 : vector<2x32xf32>
    %154 = math.exp %153 : vector<2x32xf32>
    %cst_46 = arith.constant 1.000000e+00 : f32
    %155 = vector.broadcast %cst_46 : f32 to vector<2x32xf32>
    %156 = arith.addf %155, %154 : vector<2x32xf32>
    %157 = arith.divf %155, %156 : vector<2x32xf32>
    %158 = vector.extract_strided_slice %145 {offsets = [0, 64], sizes = [2, 32], strides = [1, 1]} : vector<2x128xf32> to vector<2x32xf32>
    %159 = math.tanh %158 : vector<2x32xf32>
    %160 = vector.extract_strided_slice %145 {offsets = [0, 96], sizes = [2, 32], strides = [1, 1]} : vector<2x128xf32> to vector<2x32xf32>
    %161 = arith.negf %160 : vector<2x32xf32>
    %162 = math.exp %161 : vector<2x32xf32>
    %cst_47 = arith.constant 1.000000e+00 : f32
    %163 = vector.broadcast %cst_47 : f32 to vector<2x32xf32>
    %164 = arith.addf %163, %162 : vector<2x32xf32>
    %165 = arith.divf %163, %164 : vector<2x32xf32>
    %166 = arith.mulf %157, %135 : vector<2x32xf32>
    %167 = arith.mulf %151, %159 : vector<2x32xf32>
    %168 = arith.addf %166, %167 : vector<2x32xf32>
    %169 = math.tanh %168 : vector<2x32xf32>
    %170 = arith.mulf %165, %169 : vector<2x32xf32>
    %c2_i32_48 = arith.constant 2 : i32
    %171 = arith.muli %c4_i32, %c2_i32_48 : i32
    %172 = arith.index_cast %171 : i32 to index
    %c0_49 = arith.constant 0 : index
    %173 = vector.load %arg13[%172, %c0_49] : memref<16x32xf32, #tpu.memory_space<vmem>>, vector<2x32xf32>
    tpu.vector_store %arg13[%172, %c0_49], %170 {strides = array<i32>} : memref<16x32xf32, #tpu.memory_space<vmem>>, vector<2x32xf32>,
    %c5_i32 = arith.constant 5 : i32
    %c2_i32_50 = arith.constant 2 : i32
    %174 = arith.muli %c5_i32, %c2_i32_50 : i32
    %175 = arith.index_cast %174 : i32 to index
    %c0_51 = arith.constant 0 : index
    %176 = vector.load %arg12[%175, %c0_51] : memref<16x128xf32, #tpu.memory_space<vmem>>, vector<2x128xf32>
    %cst_52 = arith.constant dense<0.000000e+00> : vector<2x128xf32>
    %177 = tpu.matmul %170, %8, %cst_52 {dimension_numbers = #tpu.dot_dimension_numbers<[1], [0], [0], [1], [0, 0, 1, 1], [], []>} : vector<2x32xf32>, vector<32x128xf32>, vector<2x128xf32> -> vector<2x128xf32>
    %178 = arith.addf %176, %177 : vector<2x128xf32>
    %179 = vector.extract_strided_slice %178 {offsets = [0, 0], sizes = [2, 32], strides = [1, 1]} : vector<2x128xf32> to vector<2x32xf32>
    %180 = arith.negf %179 : vector<2x32xf32>
    %181 = math.exp %180 : vector<2x32xf32>
    %cst_53 = arith.constant 1.000000e+00 : f32
    %182 = vector.broadcast %cst_53 : f32 to vector<2x32xf32>
    %183 = arith.addf %182, %181 : vector<2x32xf32>
    %184 = arith.divf %182, %183 : vector<2x32xf32>
    %185 = vector.extract_strided_slice %178 {offsets = [0, 32], sizes = [2, 32], strides = [1, 1]} : vector<2x128xf32> to vector<2x32xf32>
    %186 = arith.negf %185 : vector<2x32xf32>
    %187 = math.exp %186 : vector<2x32xf32>
    %cst_54 = arith.constant 1.000000e+00 : f32
    %188 = vector.broadcast %cst_54 : f32 to vector<2x32xf32>
    %189 = arith.addf %188, %187 : vector<2x32xf32>
    %190 = arith.divf %188, %189 : vector<2x32xf32>
    %191 = vector.extract_strided_slice %178 {offsets = [0, 64], sizes = [2, 32], strides = [1, 1]} : vector<2x128xf32> to vector<2x32xf32>
    %192 = math.tanh %191 : vector<2x32xf32>
    %193 = vector.extract_strided_slice %178 {offsets = [0, 96], sizes = [2, 32], strides = [1, 1]} : vector<2x128xf32> to vector<2x32xf32>
    %194 = arith.negf %193 : vector<2x32xf32>
    %195 = math.exp %194 : vector<2x32xf32>
    %cst_55 = arith.constant 1.000000e+00 : f32
    %196 = vector.broadcast %cst_55 : f32 to vector<2x32xf32>
    %197 = arith.addf %196, %195 : vector<2x32xf32>
    %198 = arith.divf %196, %197 : vector<2x32xf32>
    %199 = arith.mulf %190, %168 : vector<2x32xf32>
    %200 = arith.mulf %184, %192 : vector<2x32xf32>
    %201 = arith.addf %199, %200 : vector<2x32xf32>
    %202 = math.tanh %201 : vector<2x32xf32>
    %203 = arith.mulf %198, %202 : vector<2x32xf32>
    %c2_i32_56 = arith.constant 2 : i32
    %204 = arith.muli %c5_i32, %c2_i32_56 : i32
    %205 = arith.index_cast %204 : i32 to index
    %c0_57 = arith.constant 0 : index
    %206 = vector.load %arg13[%205, %c0_57] : memref<16x32xf32, #tpu.memory_space<vmem>>, vector<2x32xf32>
    tpu.vector_store %arg13[%205, %c0_57], %203 {strides = array<i32>} : memref<16x32xf32, #tpu.memory_space<vmem>>, vector<2x32xf32>,
    %c6_i32 = arith.constant 6 : i32
    %c2_i32_58 = arith.constant 2 : i32
    %207 = arith.muli %c6_i32, %c2_i32_58 : i32
    %208 = arith.index_cast %207 : i32 to index
    %c0_59 = arith.constant 0 : index
    %209 = vector.load %arg12[%208, %c0_59] : memref<16x128xf32, #tpu.memory_space<vmem>>, vector<2x128xf32>
    %cst_60 = arith.constant dense<0.000000e+00> : vector<2x128xf32>
    %210 = tpu.matmul %203, %8, %cst_60 {dimension_numbers = #tpu.dot_dimension_numbers<[1], [0], [0], [1], [0, 0, 1, 1], [], []>} : vector<2x32xf32>, vector<32x128xf32>, vector<2x128xf32> -> vector<2x128xf32>
    %211 = arith.addf %209, %210 : vector<2x128xf32>
    %212 = vector.extract_strided_slice %211 {offsets = [0, 0], sizes = [2, 32], strides = [1, 1]} : vector<2x128xf32> to vector<2x32xf32>
    %213 = arith.negf %212 : vector<2x32xf32>
    %214 = math.exp %213 : vector<2x32xf32>
    %cst_61 = arith.constant 1.000000e+00 : f32
    %215 = vector.broadcast %cst_61 : f32 to vector<2x32xf32>
    %216 = arith.addf %215, %214 : vector<2x32xf32>
    %217 = arith.divf %215, %216 : vector<2x32xf32>
    %218 = vector.extract_strided_slice %211 {offsets = [0, 32], sizes = [2, 32], strides = [1, 1]} : vector<2x128xf32> to vector<2x32xf32>
    %219 = arith.negf %218 : vector<2x32xf32>
    %220 = math.exp %219 : vector<2x32xf32>
    %cst_62 = arith.constant 1.000000e+00 : f32
    %221 = vector.broadcast %cst_62 : f32 to vector<2x32xf32>
    %222 = arith.addf %221, %220 : vector<2x32xf32>
    %223 = arith.divf %221, %222 : vector<2x32xf32>
    %224 = vector.extract_strided_slice %211 {offsets = [0, 64], sizes = [2, 32], strides = [1, 1]} : vector<2x128xf32> to vector<2x32xf32>
    %225 = math.tanh %224 : vector<2x32xf32>
    %226 = vector.extract_strided_slice %211 {offsets = [0, 96], sizes = [2, 32], strides = [1, 1]} : vector<2x128xf32> to vector<2x32xf32>
    %227 = arith.negf %226 : vector<2x32xf32>
    %228 = math.exp %227 : vector<2x32xf32>
    %cst_63 = arith.constant 1.000000e+00 : f32
    %229 = vector.broadcast %cst_63 : f32 to vector<2x32xf32>
    %230 = arith.addf %229, %228 : vector<2x32xf32>
    %231 = arith.divf %229, %230 : vector<2x32xf32>
    %232 = arith.mulf %223, %201 : vector<2x32xf32>
    %233 = arith.mulf %217, %225 : vector<2x32xf32>
    %234 = arith.addf %232, %233 : vector<2x32xf32>
    %235 = math.tanh %234 : vector<2x32xf32>
    %236 = arith.mulf %231, %235 : vector<2x32xf32>
    %c2_i32_64 = arith.constant 2 : i32
    %237 = arith.muli %c6_i32, %c2_i32_64 : i32
    %238 = arith.index_cast %237 : i32 to index
    %c0_65 = arith.constant 0 : index
    %239 = vector.load %arg13[%238, %c0_65] : memref<16x32xf32, #tpu.memory_space<vmem>>, vector<2x32xf32>
    tpu.vector_store %arg13[%238, %c0_65], %236 {strides = array<i32>} : memref<16x32xf32, #tpu.memory_space<vmem>>, vector<2x32xf32>,
    %c7_i32 = arith.constant 7 : i32
    %c2_i32_66 = arith.constant 2 : i32
    %240 = arith.muli %c7_i32, %c2_i32_66 : i32
    %241 = arith.index_cast %240 : i32 to index
    %c0_67 = arith.constant 0 : index
    %242 = vector.load %arg12[%241, %c0_67] : memref<16x128xf32, #tpu.memory_space<vmem>>, vector<2x128xf32>
    %cst_68 = arith.constant dense<0.000000e+00> : vector<2x128xf32>
    %243 = tpu.matmul %236, %8, %cst_68 {dimension_numbers = #tpu.dot_dimension_numbers<[1], [0], [0], [1], [0, 0, 1, 1], [], []>} : vector<2x32xf32>, vector<32x128xf32>, vector<2x128xf32> -> vector<2x128xf32>
    %244 = arith.addf %242, %243 : vector<2x128xf32>
    %245 = vector.extract_strided_slice %244 {offsets = [0, 0], sizes = [2, 32], strides = [1, 1]} : vector<2x128xf32> to vector<2x32xf32>
    %246 = arith.negf %245 : vector<2x32xf32>
    %247 = math.exp %246 : vector<2x32xf32>
    %cst_69 = arith.constant 1.000000e+00 : f32
    %248 = vector.broadcast %cst_69 : f32 to vector<2x32xf32>
    %249 = arith.addf %248, %247 : vector<2x32xf32>
    %250 = arith.divf %248, %249 : vector<2x32xf32>
    %251 = vector.extract_strided_slice %244 {offsets = [0, 32], sizes = [2, 32], strides = [1, 1]} : vector<2x128xf32> to vector<2x32xf32>
    %252 = arith.negf %251 : vector<2x32xf32>
    %253 = math.exp %252 : vector<2x32xf32>
    %cst_70 = arith.constant 1.000000e+00 : f32
    %254 = vector.broadcast %cst_70 : f32 to vector<2x32xf32>
    %255 = arith.addf %254, %253 : vector<2x32xf32>
    %256 = arith.divf %254, %255 : vector<2x32xf32>
    %257 = vector.extract_strided_slice %244 {offsets = [0, 64], sizes = [2, 32], strides = [1, 1]} : vector<2x128xf32> to vector<2x32xf32>
    %258 = math.tanh %257 : vector<2x32xf32>
    %259 = vector.extract_strided_slice %244 {offsets = [0, 96], sizes = [2, 32], strides = [1, 1]} : vector<2x128xf32> to vector<2x32xf32>
    %260 = arith.negf %259 : vector<2x32xf32>
    %261 = math.exp %260 : vector<2x32xf32>
    %cst_71 = arith.constant 1.000000e+00 : f32
    %262 = vector.broadcast %cst_71 : f32 to vector<2x32xf32>
    %263 = arith.addf %262, %261 : vector<2x32xf32>
    %264 = arith.divf %262, %263 : vector<2x32xf32>
    %265 = arith.mulf %256, %234 : vector<2x32xf32>
    %266 = arith.mulf %250, %258 : vector<2x32xf32>
    %267 = arith.addf %265, %266 : vector<2x32xf32>
    %268 = math.tanh %267 : vector<2x32xf32>
    %269 = arith.mulf %264, %268 : vector<2x32xf32>
    %c2_i32_72 = arith.constant 2 : i32
    %270 = arith.muli %c7_i32, %c2_i32_72 : i32
    %271 = arith.index_cast %270 : i32 to index
    %c0_73 = arith.constant 0 : index
    %272 = vector.load %arg13[%271, %c0_73] : memref<16x32xf32, #tpu.memory_space<vmem>>, vector<2x32xf32>
    tpu.vector_store %arg13[%271, %c0_73], %269 {strides = array<i32>} : memref<16x32xf32, #tpu.memory_space<vmem>>, vector<2x32xf32>,
    %c8_i32 = arith.constant 8 : i32
    %c0_74 = arith.constant 0 : index
    %c0_75 = arith.constant 0 : index
    %273 = vector.load %arg13[%c0_74, %c0_75] : memref<16x32xf32, #tpu.memory_space<vmem>>, vector<16x32xf32>
    %c0_76 = arith.constant 0 : index
    %c0_77 = arith.constant 0 : index
    %274 = vector.load %arg4[%c0_76, %c0_77] : memref<32x128xf32, #tpu.memory_space<vmem>>, vector<32x128xf32>
    %cst_78 = arith.constant dense<0.000000e+00> : vector<16x128xf32>
    %275 = tpu.matmul %273, %274, %cst_78 {dimension_numbers = #tpu.dot_dimension_numbers<[1], [0], [0], [1], [0, 0, 1, 1], [], []>} : vector<16x32xf32>, vector<32x128xf32>, vector<16x128xf32> -> vector<16x128xf32>
    %c0_79 = arith.constant 0 : index
    %c0_80 = arith.constant 0 : index
    %276 = vector.load %arg6[%c0_79, %c0_80] : memref<1x128xf32, #tpu.memory_space<vmem>>, vector<1x128xf32>
    %277 = vector.broadcast %276 : vector<1x128xf32> to vector<16x128xf32>
    %278 = arith.addf %275, %277 : vector<16x128xf32>
    %c0_81 = arith.constant 0 : index
    %c0_82 = arith.constant 0 : index
    %279 = vector.load %arg12[%c0_81, %c0_82] : memref<16x128xf32, #tpu.memory_space<vmem>>, vector<16x128xf32>
    tpu.vector_store %arg12[%c0_81, %c0_82], %278 {strides = array<i32>} : memref<16x128xf32, #tpu.memory_space<vmem>>, vector<16x128xf32>,
    %c0_83 = arith.constant 0 : index
    %c0_84 = arith.constant 0 : index
    %280 = vector.load %arg5[%c0_83, %c0_84] : memref<32x128xf32, #tpu.memory_space<vmem>>, vector<32x128xf32>
    %c0_i32_85 = arith.constant 0 : i32
    %c2_i32_86 = arith.constant 2 : i32
    %281 = arith.muli %c0_i32_85, %c2_i32_86 : i32
    %282 = arith.index_cast %281 : i32 to index
    %c0_87 = arith.constant 0 : index
    %283 = vector.load %arg12[%282, %c0_87] : memref<16x128xf32, #tpu.memory_space<vmem>>, vector<2x128xf32>
    %cst_88 = arith.constant dense<0.000000e+00> : vector<2x128xf32>
    %284 = tpu.matmul %0, %280, %cst_88 {dimension_numbers = #tpu.dot_dimension_numbers<[1], [0], [0], [1], [0, 0, 1, 1], [], []>} : vector<2x32xf32>, vector<32x128xf32>, vector<2x128xf32> -> vector<2x128xf32>
    %285 = arith.addf %283, %284 : vector<2x128xf32>
    %286 = vector.extract_strided_slice %285 {offsets = [0, 0], sizes = [2, 32], strides = [1, 1]} : vector<2x128xf32> to vector<2x32xf32>
    %287 = arith.negf %286 : vector<2x32xf32>
    %288 = math.exp %287 : vector<2x32xf32>
    %cst_89 = arith.constant 1.000000e+00 : f32
    %289 = vector.broadcast %cst_89 : f32 to vector<2x32xf32>
    %290 = arith.addf %289, %288 : vector<2x32xf32>
    %291 = arith.divf %289, %290 : vector<2x32xf32>
    %292 = vector.extract_strided_slice %285 {offsets = [0, 32], sizes = [2, 32], strides = [1, 1]} : vector<2x128xf32> to vector<2x32xf32>
    %293 = arith.negf %292 : vector<2x32xf32>
    %294 = math.exp %293 : vector<2x32xf32>
    %cst_90 = arith.constant 1.000000e+00 : f32
    %295 = vector.broadcast %cst_90 : f32 to vector<2x32xf32>
    %296 = arith.addf %295, %294 : vector<2x32xf32>
    %297 = arith.divf %295, %296 : vector<2x32xf32>
    %298 = vector.extract_strided_slice %285 {offsets = [0, 64], sizes = [2, 32], strides = [1, 1]} : vector<2x128xf32> to vector<2x32xf32>
    %299 = math.tanh %298 : vector<2x32xf32>
    %300 = vector.extract_strided_slice %285 {offsets = [0, 96], sizes = [2, 32], strides = [1, 1]} : vector<2x128xf32> to vector<2x32xf32>
    %301 = arith.negf %300 : vector<2x32xf32>
    %302 = math.exp %301 : vector<2x32xf32>
    %cst_91 = arith.constant 1.000000e+00 : f32
    %303 = vector.broadcast %cst_91 : f32 to vector<2x32xf32>
    %304 = arith.addf %303, %302 : vector<2x32xf32>
    %305 = arith.divf %303, %304 : vector<2x32xf32>
    %306 = arith.mulf %297, %0 : vector<2x32xf32>
    %307 = arith.mulf %291, %299 : vector<2x32xf32>
    %308 = arith.addf %306, %307 : vector<2x32xf32>
    %309 = math.tanh %308 : vector<2x32xf32>
    %310 = arith.mulf %305, %309 : vector<2x32xf32>
    %c2_i32_92 = arith.constant 2 : i32
    %311 = arith.muli %c0_i32_85, %c2_i32_92 : i32
    %312 = arith.index_cast %311 : i32 to index
    %c0_93 = arith.constant 0 : index
    %313 = vector.load %arg14[%312, %c0_93] : memref<16x32xf32, #tpu.memory_space<vmem>>, vector<2x32xf32>
    tpu.vector_store %arg14[%312, %c0_93], %310 {strides = array<i32>} : memref<16x32xf32, #tpu.memory_space<vmem>>, vector<2x32xf32>,
    %c1_i32_94 = arith.constant 1 : i32
    %c2_i32_95 = arith.constant 2 : i32
    %314 = arith.muli %c1_i32_94, %c2_i32_95 : i32
    %315 = arith.index_cast %314 : i32 to index
    %c0_96 = arith.constant 0 : index
    %316 = vector.load %arg12[%315, %c0_96] : memref<16x128xf32, #tpu.memory_space<vmem>>, vector<2x128xf32>
    %cst_97 = arith.constant dense<0.000000e+00> : vector<2x128xf32>
    %317 = tpu.matmul %310, %280, %cst_97 {dimension_numbers = #tpu.dot_dimension_numbers<[1], [0], [0], [1], [0, 0, 1, 1], [], []>} : vector<2x32xf32>, vector<32x128xf32>, vector<2x128xf32> -> vector<2x128xf32>
    %318 = arith.addf %316, %317 : vector<2x128xf32>
    %319 = vector.extract_strided_slice %318 {offsets = [0, 0], sizes = [2, 32], strides = [1, 1]} : vector<2x128xf32> to vector<2x32xf32>
    %320 = arith.negf %319 : vector<2x32xf32>
    %321 = math.exp %320 : vector<2x32xf32>
    %cst_98 = arith.constant 1.000000e+00 : f32
    %322 = vector.broadcast %cst_98 : f32 to vector<2x32xf32>
    %323 = arith.addf %322, %321 : vector<2x32xf32>
    %324 = arith.divf %322, %323 : vector<2x32xf32>
    %325 = vector.extract_strided_slice %318 {offsets = [0, 32], sizes = [2, 32], strides = [1, 1]} : vector<2x128xf32> to vector<2x32xf32>
    %326 = arith.negf %325 : vector<2x32xf32>
    %327 = math.exp %326 : vector<2x32xf32>
    %cst_99 = arith.constant 1.000000e+00 : f32
    %328 = vector.broadcast %cst_99 : f32 to vector<2x32xf32>
    %329 = arith.addf %328, %327 : vector<2x32xf32>
    %330 = arith.divf %328, %329 : vector<2x32xf32>
    %331 = vector.extract_strided_slice %318 {offsets = [0, 64], sizes = [2, 32], strides = [1, 1]} : vector<2x128xf32> to vector<2x32xf32>
    %332 = math.tanh %331 : vector<2x32xf32>
    %333 = vector.extract_strided_slice %318 {offsets = [0, 96], sizes = [2, 32], strides = [1, 1]} : vector<2x128xf32> to vector<2x32xf32>
    %334 = arith.negf %333 : vector<2x32xf32>
    %335 = math.exp %334 : vector<2x32xf32>
    %cst_100 = arith.constant 1.000000e+00 : f32
    %336 = vector.broadcast %cst_100 : f32 to vector<2x32xf32>
    %337 = arith.addf %336, %335 : vector<2x32xf32>
    %338 = arith.divf %336, %337 : vector<2x32xf32>
    %339 = arith.mulf %330, %308 : vector<2x32xf32>
    %340 = arith.mulf %324, %332 : vector<2x32xf32>
    %341 = arith.addf %339, %340 : vector<2x32xf32>
    %342 = math.tanh %341 : vector<2x32xf32>
    %343 = arith.mulf %338, %342 : vector<2x32xf32>
    %c2_i32_101 = arith.constant 2 : i32
    %344 = arith.muli %c1_i32_94, %c2_i32_101 : i32
    %345 = arith.index_cast %344 : i32 to index
    %c0_102 = arith.constant 0 : index
    %346 = vector.load %arg14[%345, %c0_102] : memref<16x32xf32, #tpu.memory_space<vmem>>, vector<2x32xf32>
    tpu.vector_store %arg14[%345, %c0_102], %343 {strides = array<i32>} : memref<16x32xf32, #tpu.memory_space<vmem>>, vector<2x32xf32>,
    %c2_i32_103 = arith.constant 2 : i32
    %c2_i32_104 = arith.constant 2 : i32
    %347 = arith.muli %c2_i32_103, %c2_i32_104 : i32
    %348 = arith.index_cast %347 : i32 to index
    %c0_105 = arith.constant 0 : index
    %349 = vector.load %arg12[%348, %c0_105] : memref<16x128xf32, #tpu.memory_space<vmem>>, vector<2x128xf32>
    %cst_106 = arith.constant dense<0.000000e+00> : vector<2x128xf32>
    %350 = tpu.matmul %343, %280, %cst_106 {dimension_numbers = #tpu.dot_dimension_numbers<[1], [0], [0], [1], [0, 0, 1, 1], [], []>} : vector<2x32xf32>, vector<32x128xf32>, vector<2x128xf32> -> vector<2x128xf32>
    %351 = arith.addf %349, %350 : vector<2x128xf32>
    %352 = vector.extract_strided_slice %351 {offsets = [0, 0], sizes = [2, 32], strides = [1, 1]} : vector<2x128xf32> to vector<2x32xf32>
    %353 = arith.negf %352 : vector<2x32xf32>
    %354 = math.exp %353 : vector<2x32xf32>
    %cst_107 = arith.constant 1.000000e+00 : f32
    %355 = vector.broadcast %cst_107 : f32 to vector<2x32xf32>
    %356 = arith.addf %355, %354 : vector<2x32xf32>
    %357 = arith.divf %355, %356 : vector<2x32xf32>
    %358 = vector.extract_strided_slice %351 {offsets = [0, 32], sizes = [2, 32], strides = [1, 1]} : vector<2x128xf32> to vector<2x32xf32>
    %359 = arith.negf %358 : vector<2x32xf32>
    %360 = math.exp %359 : vector<2x32xf32>
    %cst_108 = arith.constant 1.000000e+00 : f32
    %361 = vector.broadcast %cst_108 : f32 to vector<2x32xf32>
    %362 = arith.addf %361, %360 : vector<2x32xf32>
    %363 = arith.divf %361, %362 : vector<2x32xf32>
    %364 = vector.extract_strided_slice %351 {offsets = [0, 64], sizes = [2, 32], strides = [1, 1]} : vector<2x128xf32> to vector<2x32xf32>
    %365 = math.tanh %364 : vector<2x32xf32>
    %366 = vector.extract_strided_slice %351 {offsets = [0, 96], sizes = [2, 32], strides = [1, 1]} : vector<2x128xf32> to vector<2x32xf32>
    %367 = arith.negf %366 : vector<2x32xf32>
    %368 = math.exp %367 : vector<2x32xf32>
    %cst_109 = arith.constant 1.000000e+00 : f32
    %369 = vector.broadcast %cst_109 : f32 to vector<2x32xf32>
    %370 = arith.addf %369, %368 : vector<2x32xf32>
    %371 = arith.divf %369, %370 : vector<2x32xf32>
    %372 = arith.mulf %363, %341 : vector<2x32xf32>
    %373 = arith.mulf %357, %365 : vector<2x32xf32>
    %374 = arith.addf %372, %373 : vector<2x32xf32>
    %375 = math.tanh %374 : vector<2x32xf32>
    %376 = arith.mulf %371, %375 : vector<2x32xf32>
    %c2_i32_110 = arith.constant 2 : i32
    %377 = arith.muli %c2_i32_103, %c2_i32_110 : i32
    %378 = arith.index_cast %377 : i32 to index
    %c0_111 = arith.constant 0 : index
    %379 = vector.load %arg14[%378, %c0_111] : memref<16x32xf32, #tpu.memory_space<vmem>>, vector<2x32xf32>
    tpu.vector_store %arg14[%378, %c0_111], %376 {strides = array<i32>} : memref<16x32xf32, #tpu.memory_space<vmem>>, vector<2x32xf32>,
    %c3_i32_112 = arith.constant 3 : i32
    %c2_i32_113 = arith.constant 2 : i32
    %380 = arith.muli %c3_i32_112, %c2_i32_113 : i32
    %381 = arith.index_cast %380 : i32 to index
    %c0_114 = arith.constant 0 : index
    %382 = vector.load %arg12[%381, %c0_114] : memref<16x128xf32, #tpu.memory_space<vmem>>, vector<2x128xf32>
    %cst_115 = arith.constant dense<0.000000e+00> : vector<2x128xf32>
    %383 = tpu.matmul %376, %280, %cst_115 {dimension_numbers = #tpu.dot_dimension_numbers<[1], [0], [0], [1], [0, 0, 1, 1], [], []>} : vector<2x32xf32>, vector<32x128xf32>, vector<2x128xf32> -> vector<2x128xf32>
    %384 = arith.addf %382, %383 : vector<2x128xf32>
    %385 = vector.extract_strided_slice %384 {offsets = [0, 0], sizes = [2, 32], strides = [1, 1]} : vector<2x128xf32> to vector<2x32xf32>
    %386 = arith.negf %385 : vector<2x32xf32>
    %387 = math.exp %386 : vector<2x32xf32>
    %cst_116 = arith.constant 1.000000e+00 : f32
    %388 = vector.broadcast %cst_116 : f32 to vector<2x32xf32>
    %389 = arith.addf %388, %387 : vector<2x32xf32>
    %390 = arith.divf %388, %389 : vector<2x32xf32>
    %391 = vector.extract_strided_slice %384 {offsets = [0, 32], sizes = [2, 32], strides = [1, 1]} : vector<2x128xf32> to vector<2x32xf32>
    %392 = arith.negf %391 : vector<2x32xf32>
    %393 = math.exp %392 : vector<2x32xf32>
    %cst_117 = arith.constant 1.000000e+00 : f32
    %394 = vector.broadcast %cst_117 : f32 to vector<2x32xf32>
    %395 = arith.addf %394, %393 : vector<2x32xf32>
    %396 = arith.divf %394, %395 : vector<2x32xf32>
    %397 = vector.extract_strided_slice %384 {offsets = [0, 64], sizes = [2, 32], strides = [1, 1]} : vector<2x128xf32> to vector<2x32xf32>
    %398 = math.tanh %397 : vector<2x32xf32>
    %399 = vector.extract_strided_slice %384 {offsets = [0, 96], sizes = [2, 32], strides = [1, 1]} : vector<2x128xf32> to vector<2x32xf32>
    %400 = arith.negf %399 : vector<2x32xf32>
    %401 = math.exp %400 : vector<2x32xf32>
    %cst_118 = arith.constant 1.000000e+00 : f32
    %402 = vector.broadcast %cst_118 : f32 to vector<2x32xf32>
    %403 = arith.addf %402, %401 : vector<2x32xf32>
    %404 = arith.divf %402, %403 : vector<2x32xf32>
    %405 = arith.mulf %396, %374 : vector<2x32xf32>
    %406 = arith.mulf %390, %398 : vector<2x32xf32>
    %407 = arith.addf %405, %406 : vector<2x32xf32>
    %408 = math.tanh %407 : vector<2x32xf32>
    %409 = arith.mulf %404, %408 : vector<2x32xf32>
    %c2_i32_119 = arith.constant 2 : i32
    %410 = arith.muli %c3_i32_112, %c2_i32_119 : i32
    %411 = arith.index_cast %410 : i32 to index
    %c0_120 = arith.constant 0 : index
    %412 = vector.load %arg14[%411, %c0_120] : memref<16x32xf32, #tpu.memory_space<vmem>>, vector<2x32xf32>
    tpu.vector_store %arg14[%411, %c0_120], %409 {strides = array<i32>} : memref<16x32xf32, #tpu.memory_space<vmem>>, vector<2x32xf32>,
    %c4_i32_121 = arith.constant 4 : i32
    %c2_i32_122 = arith.constant 2 : i32
    %413 = arith.muli %c4_i32_121, %c2_i32_122 : i32
    %414 = arith.index_cast %413 : i32 to index
    %c0_123 = arith.constant 0 : index
    %415 = vector.load %arg12[%414, %c0_123] : memref<16x128xf32, #tpu.memory_space<vmem>>, vector<2x128xf32>
    %cst_124 = arith.constant dense<0.000000e+00> : vector<2x128xf32>
    %416 = tpu.matmul %409, %280, %cst_124 {dimension_numbers = #tpu.dot_dimension_numbers<[1], [0], [0], [1], [0, 0, 1, 1], [], []>} : vector<2x32xf32>, vector<32x128xf32>, vector<2x128xf32> -> vector<2x128xf32>
    %417 = arith.addf %415, %416 : vector<2x128xf32>
    %418 = vector.extract_strided_slice %417 {offsets = [0, 0], sizes = [2, 32], strides = [1, 1]} : vector<2x128xf32> to vector<2x32xf32>
    %419 = arith.negf %418 : vector<2x32xf32>
    %420 = math.exp %419 : vector<2x32xf32>
    %cst_125 = arith.constant 1.000000e+00 : f32
    %421 = vector.broadcast %cst_125 : f32 to vector<2x32xf32>
    %422 = arith.addf %421, %420 : vector<2x32xf32>
    %423 = arith.divf %421, %422 : vector<2x32xf32>
    %424 = vector.extract_strided_slice %417 {offsets = [0, 32], sizes = [2, 32], strides = [1, 1]} : vector<2x128xf32> to vector<2x32xf32>
    %425 = arith.negf %424 : vector<2x32xf32>
    %426 = math.exp %425 : vector<2x32xf32>
    %cst_126 = arith.constant 1.000000e+00 : f32
    %427 = vector.broadcast %cst_126 : f32 to vector<2x32xf32>
    %428 = arith.addf %427, %426 : vector<2x32xf32>
    %429 = arith.divf %427, %428 : vector<2x32xf32>
    %430 = vector.extract_strided_slice %417 {offsets = [0, 64], sizes = [2, 32], strides = [1, 1]} : vector<2x128xf32> to vector<2x32xf32>
    %431 = math.tanh %430 : vector<2x32xf32>
    %432 = vector.extract_strided_slice %417 {offsets = [0, 96], sizes = [2, 32], strides = [1, 1]} : vector<2x128xf32> to vector<2x32xf32>
    %433 = arith.negf %432 : vector<2x32xf32>
    %434 = math.exp %433 : vector<2x32xf32>
    %cst_127 = arith.constant 1.000000e+00 : f32
    %435 = vector.broadcast %cst_127 : f32 to vector<2x32xf32>
    %436 = arith.addf %435, %434 : vector<2x32xf32>
    %437 = arith.divf %435, %436 : vector<2x32xf32>
    %438 = arith.mulf %429, %407 : vector<2x32xf32>
    %439 = arith.mulf %423, %431 : vector<2x32xf32>
    %440 = arith.addf %438, %439 : vector<2x32xf32>
    %441 = math.tanh %440 : vector<2x32xf32>
    %442 = arith.mulf %437, %441 : vector<2x32xf32>
    %c2_i32_128 = arith.constant 2 : i32
    %443 = arith.muli %c4_i32_121, %c2_i32_128 : i32
    %444 = arith.index_cast %443 : i32 to index
    %c0_129 = arith.constant 0 : index
    %445 = vector.load %arg14[%444, %c0_129] : memref<16x32xf32, #tpu.memory_space<vmem>>, vector<2x32xf32>
    tpu.vector_store %arg14[%444, %c0_129], %442 {strides = array<i32>} : memref<16x32xf32, #tpu.memory_space<vmem>>, vector<2x32xf32>,
    %c5_i32_130 = arith.constant 5 : i32
    %c2_i32_131 = arith.constant 2 : i32
    %446 = arith.muli %c5_i32_130, %c2_i32_131 : i32
    %447 = arith.index_cast %446 : i32 to index
    %c0_132 = arith.constant 0 : index
    %448 = vector.load %arg12[%447, %c0_132] : memref<16x128xf32, #tpu.memory_space<vmem>>, vector<2x128xf32>
    %cst_133 = arith.constant dense<0.000000e+00> : vector<2x128xf32>
    %449 = tpu.matmul %442, %280, %cst_133 {dimension_numbers = #tpu.dot_dimension_numbers<[1], [0], [0], [1], [0, 0, 1, 1], [], []>} : vector<2x32xf32>, vector<32x128xf32>, vector<2x128xf32> -> vector<2x128xf32>
    %450 = arith.addf %448, %449 : vector<2x128xf32>
    %451 = vector.extract_strided_slice %450 {offsets = [0, 0], sizes = [2, 32], strides = [1, 1]} : vector<2x128xf32> to vector<2x32xf32>
    %452 = arith.negf %451 : vector<2x32xf32>
    %453 = math.exp %452 : vector<2x32xf32>
    %cst_134 = arith.constant 1.000000e+00 : f32
    %454 = vector.broadcast %cst_134 : f32 to vector<2x32xf32>
    %455 = arith.addf %454, %453 : vector<2x32xf32>
    %456 = arith.divf %454, %455 : vector<2x32xf32>
    %457 = vector.extract_strided_slice %450 {offsets = [0, 32], sizes = [2, 32], strides = [1, 1]} : vector<2x128xf32> to vector<2x32xf32>
    %458 = arith.negf %457 : vector<2x32xf32>
    %459 = math.exp %458 : vector<2x32xf32>
    %cst_135 = arith.constant 1.000000e+00 : f32
    %460 = vector.broadcast %cst_135 : f32 to vector<2x32xf32>
    %461 = arith.addf %460, %459 : vector<2x32xf32>
    %462 = arith.divf %460, %461 : vector<2x32xf32>
    %463 = vector.extract_strided_slice %450 {offsets = [0, 64], sizes = [2, 32], strides = [1, 1]} : vector<2x128xf32> to vector<2x32xf32>
    %464 = math.tanh %463 : vector<2x32xf32>
    %465 = vector.extract_strided_slice %450 {offsets = [0, 96], sizes = [2, 32], strides = [1, 1]} : vector<2x128xf32> to vector<2x32xf32>
    %466 = arith.negf %465 : vector<2x32xf32>
    %467 = math.exp %466 : vector<2x32xf32>
    %cst_136 = arith.constant 1.000000e+00 : f32
    %468 = vector.broadcast %cst_136 : f32 to vector<2x32xf32>
    %469 = arith.addf %468, %467 : vector<2x32xf32>
    %470 = arith.divf %468, %469 : vector<2x32xf32>
    %471 = arith.mulf %462, %440 : vector<2x32xf32>
    %472 = arith.mulf %456, %464 : vector<2x32xf32>
    %473 = arith.addf %471, %472 : vector<2x32xf32>
    %474 = math.tanh %473 : vector<2x32xf32>
    %475 = arith.mulf %470, %474 : vector<2x32xf32>
    %c2_i32_137 = arith.constant 2 : i32
    %476 = arith.muli %c5_i32_130, %c2_i32_137 : i32
    %477 = arith.index_cast %476 : i32 to index
    %c0_138 = arith.constant 0 : index
    %478 = vector.load %arg14[%477, %c0_138] : memref<16x32xf32, #tpu.memory_space<vmem>>, vector<2x32xf32>
    tpu.vector_store %arg14[%477, %c0_138], %475 {strides = array<i32>} : memref<16x32xf32, #tpu.memory_space<vmem>>, vector<2x32xf32>,
    %c6_i32_139 = arith.constant 6 : i32
    %c2_i32_140 = arith.constant 2 : i32
    %479 = arith.muli %c6_i32_139, %c2_i32_140 : i32
    %480 = arith.index_cast %479 : i32 to index
    %c0_141 = arith.constant 0 : index
    %481 = vector.load %arg12[%480, %c0_141] : memref<16x128xf32, #tpu.memory_space<vmem>>, vector<2x128xf32>
    %cst_142 = arith.constant dense<0.000000e+00> : vector<2x128xf32>
    %482 = tpu.matmul %475, %280, %cst_142 {dimension_numbers = #tpu.dot_dimension_numbers<[1], [0], [0], [1], [0, 0, 1, 1], [], []>} : vector<2x32xf32>, vector<32x128xf32>, vector<2x128xf32> -> vector<2x128xf32>
    %483 = arith.addf %481, %482 : vector<2x128xf32>
    %484 = vector.extract_strided_slice %483 {offsets = [0, 0], sizes = [2, 32], strides = [1, 1]} : vector<2x128xf32> to vector<2x32xf32>
    %485 = arith.negf %484 : vector<2x32xf32>
    %486 = math.exp %485 : vector<2x32xf32>
    %cst_143 = arith.constant 1.000000e+00 : f32
    %487 = vector.broadcast %cst_143 : f32 to vector<2x32xf32>
    %488 = arith.addf %487, %486 : vector<2x32xf32>
    %489 = arith.divf %487, %488 : vector<2x32xf32>
    %490 = vector.extract_strided_slice %483 {offsets = [0, 32], sizes = [2, 32], strides = [1, 1]} : vector<2x128xf32> to vector<2x32xf32>
    %491 = arith.negf %490 : vector<2x32xf32>
    %492 = math.exp %491 : vector<2x32xf32>
    %cst_144 = arith.constant 1.000000e+00 : f32
    %493 = vector.broadcast %cst_144 : f32 to vector<2x32xf32>
    %494 = arith.addf %493, %492 : vector<2x32xf32>
    %495 = arith.divf %493, %494 : vector<2x32xf32>
    %496 = vector.extract_strided_slice %483 {offsets = [0, 64], sizes = [2, 32], strides = [1, 1]} : vector<2x128xf32> to vector<2x32xf32>
    %497 = math.tanh %496 : vector<2x32xf32>
    %498 = vector.extract_strided_slice %483 {offsets = [0, 96], sizes = [2, 32], strides = [1, 1]} : vector<2x128xf32> to vector<2x32xf32>
    %499 = arith.negf %498 : vector<2x32xf32>
    %500 = math.exp %499 : vector<2x32xf32>
    %cst_145 = arith.constant 1.000000e+00 : f32
    %501 = vector.broadcast %cst_145 : f32 to vector<2x32xf32>
    %502 = arith.addf %501, %500 : vector<2x32xf32>
    %503 = arith.divf %501, %502 : vector<2x32xf32>
    %504 = arith.mulf %495, %473 : vector<2x32xf32>
    %505 = arith.mulf %489, %497 : vector<2x32xf32>
    %506 = arith.addf %504, %505 : vector<2x32xf32>
    %507 = math.tanh %506 : vector<2x32xf32>
    %508 = arith.mulf %503, %507 : vector<2x32xf32>
    %c2_i32_146 = arith.constant 2 : i32
    %509 = arith.muli %c6_i32_139, %c2_i32_146 : i32
    %510 = arith.index_cast %509 : i32 to index
    %c0_147 = arith.constant 0 : index
    %511 = vector.load %arg14[%510, %c0_147] : memref<16x32xf32, #tpu.memory_space<vmem>>, vector<2x32xf32>
    tpu.vector_store %arg14[%510, %c0_147], %508 {strides = array<i32>} : memref<16x32xf32, #tpu.memory_space<vmem>>, vector<2x32xf32>,
    %c7_i32_148 = arith.constant 7 : i32
    %c2_i32_149 = arith.constant 2 : i32
    %512 = arith.muli %c7_i32_148, %c2_i32_149 : i32
    %513 = arith.index_cast %512 : i32 to index
    %c0_150 = arith.constant 0 : index
    %514 = vector.load %arg12[%513, %c0_150] : memref<16x128xf32, #tpu.memory_space<vmem>>, vector<2x128xf32>
    %cst_151 = arith.constant dense<0.000000e+00> : vector<2x128xf32>
    %515 = tpu.matmul %508, %280, %cst_151 {dimension_numbers = #tpu.dot_dimension_numbers<[1], [0], [0], [1], [0, 0, 1, 1], [], []>} : vector<2x32xf32>, vector<32x128xf32>, vector<2x128xf32> -> vector<2x128xf32>
    %516 = arith.addf %514, %515 : vector<2x128xf32>
    %517 = vector.extract_strided_slice %516 {offsets = [0, 0], sizes = [2, 32], strides = [1, 1]} : vector<2x128xf32> to vector<2x32xf32>
    %518 = arith.negf %517 : vector<2x32xf32>
    %519 = math.exp %518 : vector<2x32xf32>
    %cst_152 = arith.constant 1.000000e+00 : f32
    %520 = vector.broadcast %cst_152 : f32 to vector<2x32xf32>
    %521 = arith.addf %520, %519 : vector<2x32xf32>
    %522 = arith.divf %520, %521 : vector<2x32xf32>
    %523 = vector.extract_strided_slice %516 {offsets = [0, 32], sizes = [2, 32], strides = [1, 1]} : vector<2x128xf32> to vector<2x32xf32>
    %524 = arith.negf %523 : vector<2x32xf32>
    %525 = math.exp %524 : vector<2x32xf32>
    %cst_153 = arith.constant 1.000000e+00 : f32
    %526 = vector.broadcast %cst_153 : f32 to vector<2x32xf32>
    %527 = arith.addf %526, %525 : vector<2x32xf32>
    %528 = arith.divf %526, %527 : vector<2x32xf32>
    %529 = vector.extract_strided_slice %516 {offsets = [0, 64], sizes = [2, 32], strides = [1, 1]} : vector<2x128xf32> to vector<2x32xf32>
    %530 = math.tanh %529 : vector<2x32xf32>
    %531 = vector.extract_strided_slice %516 {offsets = [0, 96], sizes = [2, 32], strides = [1, 1]} : vector<2x128xf32> to vector<2x32xf32>
    %532 = arith.negf %531 : vector<2x32xf32>
    %533 = math.exp %532 : vector<2x32xf32>
    %cst_154 = arith.constant 1.000000e+00 : f32
    %534 = vector.broadcast %cst_154 : f32 to vector<2x32xf32>
    %535 = arith.addf %534, %533 : vector<2x32xf32>
    %536 = arith.divf %534, %535 : vector<2x32xf32>
    %537 = arith.mulf %528, %506 : vector<2x32xf32>
    %538 = arith.mulf %522, %530 : vector<2x32xf32>
    %539 = arith.addf %537, %538 : vector<2x32xf32>
    %540 = math.tanh %539 : vector<2x32xf32>
    %541 = arith.mulf %536, %540 : vector<2x32xf32>
    %c2_i32_155 = arith.constant 2 : i32
    %542 = arith.muli %c7_i32_148, %c2_i32_155 : i32
    %543 = arith.index_cast %542 : i32 to index
    %c0_156 = arith.constant 0 : index
    %544 = vector.load %arg14[%543, %c0_156] : memref<16x32xf32, #tpu.memory_space<vmem>>, vector<2x32xf32>
    tpu.vector_store %arg14[%543, %c0_156], %541 {strides = array<i32>} : memref<16x32xf32, #tpu.memory_space<vmem>>, vector<2x32xf32>,
    %c8_i32_157 = arith.constant 8 : i32
    %c0_158 = arith.constant 0 : index
    %c0_159 = arith.constant 0 : index
    %545 = vector.load %arg14[%c0_158, %c0_159] : memref<16x32xf32, #tpu.memory_space<vmem>>, vector<16x32xf32>
    %c0_160 = arith.constant 0 : index
    %c0_161 = arith.constant 0 : index
    %546 = vector.load %arg7[%c0_160, %c0_161] : memref<32x64xf32, #tpu.memory_space<vmem>>, vector<32x64xf32>
    %cst_162 = arith.constant dense<0.000000e+00> : vector<16x64xf32>
    %547 = tpu.matmul %545, %546, %cst_162 {dimension_numbers = #tpu.dot_dimension_numbers<[1], [0], [0], [1], [0, 0, 1, 1], [], []>} : vector<16x32xf32>, vector<32x64xf32>, vector<16x64xf32> -> vector<16x64xf32>
    %c0_163 = arith.constant 0 : index
    %c0_164 = arith.constant 0 : index
    %548 = vector.load %arg8[%c0_163, %c0_164] : memref<1x64xf32, #tpu.memory_space<vmem>>, vector<1x64xf32>
    %549 = vector.broadcast %548 : vector<1x64xf32> to vector<16x64xf32>
    %550 = arith.addf %547, %549 : vector<16x64xf32>
    %cst_165 = arith.constant 0.000000e+00 : f32
    %551 = vector.broadcast %cst_165 : f32 to vector<16x64xf32>
    %552 = arith.maximumf %550, %551 : vector<16x64xf32>
    %553 = vector.broadcast %cst_165 : f32 to vector<16x64xf32>
    %554 = arith.subf %550, %553 : vector<16x64xf32>
    %555 = arith.cmpf one, %554, %554 : vector<16x64xf32>
    %556 = vector.broadcast %cst_165 : f32 to vector<16x64xf32>
    %557 = arith.addf %550, %556 : vector<16x64xf32>
    %558 = math.absf %554 : vector<16x64xf32>
    %cst_166 = arith.constant 0.000000e+00 : f32
    %559 = vector.broadcast %cst_166 : f32 to vector<16x64xf32>
    %560 = arith.subf %559, %558 : vector<16x64xf32>
    %561 = math.exp %560 : vector<16x64xf32>
    %562 = math.log1p %561 : vector<16x64xf32>
    %563 = arith.addf %552, %562 : vector<16x64xf32>
    %564 = arith.select %555, %557, %563 : vector<16x64xi1>, vector<16x64xf32>
    %565 = math.tanh %564 : vector<16x64xf32>
    %566 = arith.mulf %550, %565 : vector<16x64xf32>
    %c0_167 = arith.constant 0 : index
    %c0_168 = arith.constant 0 : index
    %567 = vector.load %arg9[%c0_167, %c0_168] : memref<64x16xf32, #tpu.memory_space<vmem>>, vector<64x16xf32>
    %cst_169 = arith.constant dense<0.000000e+00> : vector<16x16xf32>
    %568 = tpu.matmul %566, %567, %cst_169 {dimension_numbers = #tpu.dot_dimension_numbers<[1], [0], [0], [1], [0, 0, 1, 1], [], []>} : vector<16x64xf32>, vector<64x16xf32>, vector<16x16xf32> -> vector<16x16xf32>
    %c0_170 = arith.constant 0 : index
    %c0_171 = arith.constant 0 : index
    %569 = vector.load %arg10[%c0_170, %c0_171] : memref<1x16xf32, #tpu.memory_space<vmem>>, vector<1x16xf32>
    %570 = vector.broadcast %569 : vector<1x16xf32> to vector<16x16xf32>
    %571 = arith.addf %568, %570 : vector<16x16xf32>
    %c0_172 = arith.constant 0 : index
    %c0_173 = arith.constant 0 : index
    %572 = vector.load %arg11[%c0_172, %c0_173] : memref<16x16xf32, #tpu.memory_space<vmem>>, vector<16x16xf32>
    tpu.vector_store %arg11[%c0_172, %c0_173], %571 {strides = array<i32>} : memref<16x16xf32, #tpu.memory_space<vmem>>, vector<16x16xf32>,
    return
  }
}

</mosaic_0001>

<bundles_post_ra>
// kernel: lstm_net_forward.1
= control target key start
LH: loop header
LB: loop body
LE: loop exit
PB: predicated region body
PF: predicated region fallthrough
CT: control target
= control target key end

     0   :  { %16 = vsyncpa [#allocation6], 0  ;;  %s3265_s0 = inlined_call_operand.vmem [shape: f32[16,16], index: 0, kind: input, shape index: {}]   ;;  %s3266_s1 = inlined_call_operand.hbm [shape: f32[16,128], index: 1, kind: input, shape index: {}]   ;;  %s3267_s2 = inlined_call_operand.vmem [shape: f32[32,128], index: 2, kind: input, shape index: {}]   ;;  %s3268_s3 = inlined_call_operand.hbm [shape: f32[1,128], index: 3, kind: input, shape index: {}]   ;;  %s3269_s4 = inlined_call_operand.vmem [shape: f32[32,128], index: 4, kind: input, shape index: {}]   ;;  %s3270_s5 = inlined_call_operand.vmem [shape: f32[32,128], index: 5, kind: input, shape index: {}]   ;;  %s3271_s6 = inlined_call_operand.hbm [shape: f32[1,128], index: 6, kind: input, shape index: {}]   ;;  %s3272_s7 = inlined_call_operand.vmem [shape: f32[32,64], index: 7, kind: input, shape index: {}]   ;;  %s3273_s8 = inlined_call_operand.hbm [shape: f32[1,64], index: 8, kind: input, shape index: {}]   ;;  %s3274_s9 = inlined_call_operand.vmem [shape: f32[64,16], index: 9, kind: input, shape index: {}]   ;;  %s3275_s10 = inlined_call_operand.hbm [shape: f32[1,16], index: 10, kind: input, shape index: {}]   ;;  %s3276_s11 = inlined_call_operand.vmem [shape: f32[16,16], index: 11, kind: output, shape index: {}]  }
   0x1   :  { %17 = vsyncpa [#allocation8], 0 }
   0x2   :  { %18 = vsyncpa [#allocation11], 0  ;;  %s2815_s17 = smov [#allocation7]   ;;  %s2816_s19 = smov [#allocation10]  }
   0x3   :  { %s41_s18 = sshll.u32 %s2815_s17, 4  ;;  %s67_s20 = sshll.u32 %s2816_s19, 4  ;;  %s42_s18 = int_to_ptr.vmem [resolvable:$true] %s41_s18  ;;  %s68_s20 = int_to_ptr.vmem [resolvable:$true] %s67_s20 }
   0x4   :  { %s2717_s21 = scalar_lea.vmem %s42_s18, 16  ;;  %s2721_s22 = scalar_lea.vmem %s42_s18, 32 }
   0x5   :  { %p2718_p0 = scmp.ne.s32.totalorder %s42_s18, %s2717_s21  ;;  %p2722_p1 = scmp.lt.s32.totalorder %s42_s18, %s42_s18 }
   0x6   :  { %p2723_p2 = scmp.lt.s32.totalorder %s2721_s22, %s2717_s21 }
   0x8   :  { %p2724_p3 = por %p2723_p2, %p2722_p1 }
   0xa   :  { %p2725_p4 = pnand %p2724_p3, %p2718_p0 }
   0xc   :  { %2728 = shalt.err (!%p2725_p4)
}
   0xd   :  { %44 = dma.hbm_to_vmem [thread:$0]  %s3268_s3, 16, %s42_s18, [#allocation8]  }
   0xe   :  { %s2737_s25 = scalar_lea.vmem %s68_s20, 16  ;;  %s2741_s26 = scalar_lea.vmem %s68_s20, 32 }
   0xf   :  { %p2738_p5 = scmp.ne.s32.totalorder %s68_s20, %s2737_s25  ;;  %p2742_p6 = scmp.lt.s32.totalorder %s68_s20, %s68_s20 }
  0x10   :  { %p2743_p7 = scmp.lt.s32.totalorder %s2741_s26, %s2737_s25 }
  0x12   :  { %p2744_p8 = por %p2743_p7, %p2742_p6 }
  0x14   :  { %p2745_p9 = pnand %p2744_p8, %p2738_p5 }
  0x16   :  { %2748 = shalt.err (!%p2745_p9)
}
  0x17   :  { %70 = dma.hbm_to_vmem [thread:$0]  %s3273_s8, 16, %s68_s20, [#allocation11]  }
  0x18   :  { %s2817_s29 = smov [#allocation5]  }
  0x19   :  { %s26_s30 = sshll.u32 %s2817_s29, 4  ;;  %s27_s30 = int_to_ptr.vmem [resolvable:$true] %s26_s30 }
  0x1a   :  { %s2757_s12 = scalar_lea.vmem %s27_s30, 256  ;;  %p2762_p11 = scmp.lt.s32.totalorder %s27_s30, %s27_s30 }
  0x1b   :  { %p2758_p10 = scmp.ne.s32.totalorder %s27_s30, %s2757_s12  ;;  %p2763_p12 = scmp.lt.s32.totalorder %s2757_s12, %s2757_s12 }
  0x1d   :  { %p2764_p13 = por %p2763_p12, %p2762_p11 }
  0x1f   :  { %p2765_p0 = pnand %p2764_p13, %p2758_p10 }
  0x21   :  { %2768 = shalt.err (!%p2765_p0)
}
  0x22   :  { %s2818_s3 = smov 128   ;;  %s2819_s13 = smov 8  }
  0x23   :  { %32 = dma.hbm_to_vmem [thread:$0]  %s3266_s1, 256, %s27_s30, [#allocation6], %s2818_s3, %s2818_s3, %s2819_s13  }
  0x24   :  { %s2820_s16 = smov [#allocation9]   ;;  %s2821_s8 = smov [#allocation12]  }
  0x25   :  { %s55_s17 = sshll.u32 %s2820_s16, 4  ;;  %s79_s18 = sshll.u32 %s2821_s8, 4  ;;  %s56_s17 = int_to_ptr.vmem [resolvable:$true] %s55_s17  ;;  %s80_s18 = int_to_ptr.vmem [resolvable:$true] %s79_s18 }
  0x26   :  { %s2777_s19 = scalar_lea.vmem %s56_s17, 16  ;;  %s2781_s20 = scalar_lea.vmem %s56_s17, 32 }
  0x27   :  { %p2778_p1 = scmp.ne.s32.totalorder %s56_s17, %s2777_s19  ;;  %p2782_p2 = scmp.lt.s32.totalorder %s56_s17, %s56_s17 }
  0x28   :  { %p2783_p3 = scmp.lt.s32.totalorder %s2781_s20, %s2777_s19 }
  0x2a   :  { %p2784_p4 = por %p2783_p3, %p2782_p2 }
  0x2c   :  { %p2785_p5 = pnand %p2784_p4, %p2778_p1 }
  0x2e   :  { %2788 = shalt.err (!%p2785_p5)
}
  0x2f   :  { %58 = dma.hbm_to_vmem [thread:$0]  %s3271_s6, 16, %s56_s17, [#allocation8]  }
  0x30   :  { %s2797_s23 = scalar_lea.vmem %s80_s18, 16  ;;  %s2801_s1 = scalar_lea.vmem %s80_s18, 32 }
  0x31   :  { %p2798_p6 = scmp.ne.s32.totalorder %s80_s18, %s2797_s23  ;;  %p2802_p7 = scmp.lt.s32.totalorder %s80_s18, %s80_s18 }
  0x32   :  { %p2803_p8 = scmp.lt.s32.totalorder %s2801_s1, %s2797_s23 }
  0x34   :  { %p2804_p9 = por %p2803_p8, %p2802_p7 }
  0x36   :  { %p2805_p10 = pnand %p2804_p9, %p2798_p6 }
  0x38   :  { %2808 = shalt.err (!%p2805_p10)
}
  0x39   :  { %82 = dma.hbm_to_vmem [thread:$0]  %s3275_s10, 16, %s80_s18, [#allocation11]  }
  0x3a   :  { %2809 = dma.done.wait [#allocation6], 256  }
  0x3b   :  { %2810 = vsyncadd [#allocation6], 4294967040 }
  0x3c   :  { %2811 = dma.done.wait [#allocation8], 32  }
  0x3d   :  { %2812 = vsyncadd [#allocation8], 4294967264 }
  0x3e   :  { %2813 = dma.done.wait [#allocation11], 32  }
  0x3f   :  { %2814 = vsyncadd [#allocation11], 4294967264  ;;  %v2822_v0 = vmov 0.0   ;;  %vm2823_vm0 = vmmov 0   ;;  %vm109_vm1 = vcmask 130048   ;;  %v101_v1 = vld [vmem:[#allocation5 + $0x8] sm:$0xff] }
  0x40   :  { %2363 = vmatprep.subr.mxu1 %v2822_v0  ;;  %2371 = vmatprep.mubr.msk.f32.mxu1 %vm2823_vm0, %v2822_v0  ;;  %v100_v2 = vld [vmem:[#allocation5] sm:$0xff]  ;;  %v98_v3 = vld [vmem:[%s3265_s0] sm:$0xff]  ;;  %v2911_v4 = vld [vmem:[%s3267_s2 + $0x18] sm:$0xff]  ;;  %s2825_s15 = smov 32   ;;  %vm301_vm2 = vcmask 254976   ;;  %vm198_vm3 = vcmask 261120  }
  0x41   :  { %2334 = vmatprep.subr.mxu0 %v101_v1  ;;  %2338 = vmatprep.mubr.msk.f32.mxu0 %vm109_vm1, %v98_v3  ;;  %v99_v5 = vld [vmem:[%s3265_s0 + $0x8] sm:$0xff]  ;;  %v2920_v6 = vld [vmem:[%s3267_s2 + $0x10] sm:$0xff]  ;;  %v2942_v8 = vld [vmem:[%s3267_s2] sm:$0xff]  ;;  %vm2095_vm8 = vcmask 523264  }
  0x42   :  { %2335 = vmatpush3.msra.mxu0 %v101_v1  ;;  %2364 = vmatpush3.msra.mxu1 %v2911_v4  ;;  %v2933_v7 = vld [vmem:[%s3267_s2 + $0x8] sm:$0xff]  ;;  %v2186_v9 = vld [vmem:[#allocation7] ss:$0 sm:$0xff]  ;;  %s2824_s2 = smov 64  }
  0x43   :  { %2336 = vmatprep.subr.mxu0 %v100_v2  ;;  %2365 = vmatprep.subr.mxu1 %v2822_v0 }
  0x44   :  { %2337 = vmatpush3.msra.mxu0 %v100_v2  ;;  %2366 = vmatpush3.msra.mxu1 %v2920_v6 }
  0x45   :  { %2339 = vmatmul.mubr.msk.f32.vlgmr.msra.gmra.mxu0 %vm109_vm1, %v99_v5  ;;  %2341 = vmatprep.subr.mxu0 %v2822_v0 }
  0x46   :  { %2342 = vmatpush3.msra.mxu0 %v2911_v4  ;;  %2349 = vmatprep.mubr.msk.f32.mxu0 %vm2823_vm0, %v2822_v0 }
  0x47   :  { %2343 = vmatprep.subr.mxu0 %v2822_v0  ;;  %2367 = vmatprep.subr.mxu1 %v2822_v0 }
  0x48   :  { %2344 = vmatpush3.msra.mxu0 %v2920_v6  ;;  %2368 = vmatpush3.msra.mxu1 %v2933_v7 }
  0x49   :  { %2345 = vmatprep.subr.mxu0 %v2822_v0  ;;  %2369 = vmatprep.subr.mxu1 %v2822_v0 }
  0x4a   :  { %2346 = vmatpush3.msra.mxu0 %v2933_v7  ;;  %2370 = vmatpush3.msra.mxu1 %v2942_v8 }
  0x4b   :  { %2347 = vmatprep.subr.mxu0 %v2822_v0  ;;  %2385 = vmatprep.subr.mxu1 %v2822_v0 }
  0x4c   :  { %2348 = vmatpush3.msra.mxu0 %v2942_v8 }
  0x4d   :  { %2350 = vmatmul.mubr.f32.vlgmr.msra.gmra.mxu0 %v2822_v0  ;;  %2352 = vmatprep.subr.mxu0 %v2822_v0 }
  0x4e   :  { %2353 = vmatpush3.msra.mxu0 %v2911_v4  ;;  %2360 = vmatprep.mubr.msk.f32.mxu0 %vm2823_vm0, %v2822_v0 }
  0x4f   :  { %2354 = vmatprep.subr.mxu0 %v2822_v0 }
  0x50   :  { %2355 = vmatpush3.msra.mxu0 %v2920_v6 }
  0x51   :  { %2356 = vmatprep.subr.mxu0 %v2822_v0 }
  0x52   :  { %2357 = vmatpush3.msra.mxu0 %v2933_v7 }
  0x53   :  { %2358 = vmatprep.subr.mxu0 %v2822_v0 }
  0x54   :  { %2359 = vmatpush3.msra.mxu0 %v2942_v8 }
  0x55   :  { %2374 = vmatprep.subr.mxu0 %v2822_v0 }
 0x105   :  { %v2340_v10 = vpop.f32.mrf.mxu0 }
 0x106   :  { %v188_v11 = vadd.f32 %v2340_v10, %v2186_v9 }
 0x107   :  { %v182_v12 = vpop.f32.mrf.mxu0 }
 0x108   :  { %192 = vst [vmem:[#allocation2 + $0x8] sm:$0xff] %v188_v11  ;;  %v183_v13 = vadd.f32 %v2186_v9, %v182_v12 }
 0x10a   :  { %191 = vst [vmem:[#allocation2] sm:$0xff] %v183_v13 }
 0x10d   :  { %v268_v14 = vpop.f32.mrf.mxu0 }
 0x10f   :  { %v2351_v15 = vpop.f32.mrf.mxu0 }
 0x111   :  { %v197_v16 = vld [vmem:[#allocation2] sm:$0x3]  ;;  %v303_v32 = vld [vmem:[#allocation2 + $0x2] sm:$0x3]  ;;  %v406_v50 = vld [vmem:[#allocation2 + $0x4] sm:$0x3] }
 0x112   :  { %v272_v17 = vadd.f32 %v268_v14, %v197_v16  ;;  %v509_v9 = vld [vmem:[#allocation2 + $0x6] sm:$0x3] }
 0x114   :  { %2569 = vtanh.f32 %v272_v17  ;;  %v2189_v19 = vmul.f32 -1.442695, %v272_v17 }
 0x116   :  { %2571 = vpow2.f32 %v2189_v19 }
 0x121   :  { %v2570_v18 = vpop.eup %2569 }
 0x122   :  { %282 = vrot.lane.b32.xlu0 %v2570_v18, %s2824_s2 }
 0x123   :  { %v2572_v20 = vpop.eup %2571 }
 0x124   :  { %v276_v21 = vadd.f32 1.0, %v2572_v20 }
 0x126   :  { %2573 = vrcp.f32 %v276_v21 }
 0x133   :  { %v2574_v22 = vpop.eup %2573 }
 0x134   :  { %v280_v25 = vmul.f32 0.0, %v2574_v22 }
 0x194   :  { %v283_v23 = vpop.permute.xlu0 %282 }
 0x195   :  { %v285_v24 = vmul.f32 %v2574_v22, %v283_v23 }
 0x197   :  { %287 = vrot.lane.b32.xlu0 %v285_v24, %s2825_s15 }
 0x209   :  { %v288_v26 = vpop.permute.xlu0 %287 }
 0x20a   :  { %v290_v27 = vadd.f32 %v288_v26, %v280_v25 }
 0x20c   :  { %2575 = vtanh.f32 %v290_v27 }
 0x219   :  { %v2576_v28 = vpop.eup %2575 }
 0x21a   :  { %293 = vrot.lane.b32.xlu1 %v2576_v28, %s2824_s2 }
 0x28c   :  { %v294_v29 = vpop.permute.xlu1 %293 }
 0x28d   :  { %v296_v30 = vmul.f32 %v2574_v22, %v294_v29 }
 0x28f   :  { %298 = vrot.lane.b32.xlu1 %v296_v30, %s2825_s15 }
 0x301   :  { %v299_v31 = vpop.permute.xlu1 %298 }
 0x302   :  { %302 = vst.msk [vmem:[#allocation3] sm:$0x3] %vm301_vm2, %v299_v31  ;;  %2361 = vmatmul.mubr.msk.f32.vlgmr.msra.gmra.mxu0 %vm198_vm3, %v299_v31 }
 0x303   :  { %2375 = vmatpush3.msra.mxu0 %v2911_v4  ;;  %2382 = vmatprep.mubr.msk.f32.mxu0 %vm2823_vm0, %v2822_v0 }
 0x304   :  { %2376 = vmatprep.subr.mxu0 %v2822_v0 }
 0x305   :  { %2377 = vmatpush3.msra.mxu0 %v2920_v6 }
 0x306   :  { %2378 = vmatprep.subr.mxu0 %v2822_v0 }
 0x307   :  { %2379 = vmatpush3.msra.mxu0 %v2933_v7 }
 0x308   :  { %2380 = vmatprep.subr.mxu0 %v2822_v0 }
 0x309   :  { %2381 = vmatpush3.msra.mxu0 %v2942_v8 }
 0x30a   :  { %2396 = vmatprep.subr.mxu0 %v2822_v0 }
 0x3c2   :  { %v372_v33 = vpop.f32.mrf.mxu0 }
 0x3c3   :  { %v376_v34 = vadd.f32 %v372_v33, %v303_v32 }
 0x3c4   :  { %v2362_v35 = vpop.f32.mrf.mxu0 }
 0x3c5   :  { %2577 = vtanh.f32 %v376_v34  ;;  %v2191_v37 = vmul.f32 -1.442695, %v376_v34 }
 0x3c7   :  { %2579 = vpow2.f32 %v2191_v37 }
 0x3d2   :  { %v2578_v36 = vpop.eup %2577 }
 0x3d3   :  { %386 = vrot.lane.b32.xlu0 %v2578_v36, %s2824_s2 }
 0x3d4   :  { %v2580_v38 = vpop.eup %2579 }
 0x3d5   :  { %v380_v39 = vadd.f32 1.0, %v2580_v38 }
 0x3d7   :  { %2581 = vrcp.f32 %v380_v39 }
 0x3e4   :  { %v2582_v40 = vpop.eup %2581 }
 0x3e5   :  { %v384_v43 = vmul.f32 %v2582_v40, %v290_v27  ;;  %v612_v27 = vld [vmem:[#allocation2 + $0x8] sm:$0x3] }
 0x445   :  { %v387_v41 = vpop.permute.xlu0 %386 }
 0x446   :  { %v389_v42 = vmul.f32 %v2582_v40, %v387_v41 }
 0x448   :  { %391 = vrot.lane.b32.xlu1 %v389_v42, %s2825_s15 }
 0x4ba   :  { %v392_v44 = vpop.permute.xlu1 %391 }
 0x4bb   :  { %v394_v45 = vadd.f32 %v392_v44, %v384_v43 }
 0x4bd   :  { %2583 = vtanh.f32 %v394_v45 }
 0x4ca   :  { %v2584_v46 = vpop.eup %2583 }
 0x4cb   :  { %397 = vrot.lane.b32.xlu0 %v2584_v46, %s2824_s2 }
 0x53d   :  { %v398_v47 = vpop.permute.xlu0 %397 }
 0x53e   :  { %v400_v48 = vmul.f32 %v2582_v40, %v398_v47 }
 0x540   :  { %402 = vrot.lane.b32.xlu1 %v400_v48, %s2825_s15 }
 0x5b2   :  { %v403_v49 = vpop.permute.xlu1 %402 }
 0x5b3   :  { %405 = vst.msk [vmem:[#allocation3 + $0x2] sm:$0x3] %vm301_vm2, %v403_v49  ;;  %2372 = vmatmul.mubr.msk.f32.vlgmr.msra.gmra.mxu1 %vm198_vm3, %v403_v49 }
 0x5b4   :  { %2386 = vmatpush3.msra.mxu1 %v2911_v4  ;;  %2393 = vmatprep.mubr.msk.f32.mxu1 %vm2823_vm0, %v2822_v0 }
 0x5b5   :  { %2387 = vmatprep.subr.mxu1 %v2822_v0 }
 0x5b6   :  { %2388 = vmatpush3.msra.mxu1 %v2920_v6 }
 0x5b7   :  { %2389 = vmatprep.subr.mxu1 %v2822_v0 }
 0x5b8   :  { %2390 = vmatpush3.msra.mxu1 %v2933_v7 }
 0x5b9   :  { %2391 = vmatprep.subr.mxu1 %v2822_v0 }
 0x5ba   :  { %2392 = vmatpush3.msra.mxu1 %v2942_v8 }
 0x5bb   :  { %2407 = vmatprep.subr.mxu1 %v2822_v0 }
 0x673   :  { %v475_v51 = vpop.f32.mrf.mxu1 }
 0x674   :  { %v479_v52 = vadd.f32 %v475_v51, %v406_v50 }
 0x675   :  { %v2373_v53 = vpop.f32.mrf.mxu1 }
 0x676   :  { %2585 = vtanh.f32 %v479_v52  ;;  %v2193_v55 = vmul.f32 -1.442695, %v479_v52 }
 0x678   :  { %2587 = vpow2.f32 %v2193_v55 }
 0x683   :  { %v2586_v54 = vpop.eup %2585 }
 0x684   :  { %489 = vrot.lane.b32.xlu0 %v2586_v54, %s2824_s2 }
 0x685   :  { %v2588_v56 = vpop.eup %2587 }
 0x686   :  { %v483_v57 = vadd.f32 1.0, %v2588_v56 }
 0x688   :  { %2589 = vrcp.f32 %v483_v57 }
 0x695   :  { %v2590_v58 = vpop.eup %2589 }
 0x696   :  { %v487_v61 = vmul.f32 %v2590_v58, %v394_v45  ;;  %v715_v45 = vld [vmem:[#allocation2 + $0xa] sm:$0x3] }
 0x6f6   :  { %v490_v59 = vpop.permute.xlu0 %489 }
 0x6f7   :  { %v492_v60 = vmul.f32 %v2590_v58, %v490_v59 }
 0x6f9   :  { %494 = vrot.lane.b32.xlu1 %v492_v60, %s2825_s15  ;;  %v818_v60 = vld [vmem:[#allocation2 + $0xc] sm:$0x3] }
 0x76b   :  { %v495_v62 = vpop.permute.xlu1 %494 }
 0x76c   :  { %v497_v63 = vadd.f32 %v495_v62, %v487_v61 }
 0x76e   :  { %2591 = vtanh.f32 %v497_v63 }
 0x77b   :  { %v2592_v1 = vpop.eup %2591 }
 0x77c   :  { %500 = vrot.lane.b32.xlu0 %v2592_v1, %s2824_s2 }
 0x7ee   :  { %v501_v2 = vpop.permute.xlu0 %500 }
 0x7ef   :  { %v503_v3 = vmul.f32 %v2590_v58, %v501_v2 }
 0x7f1   :  { %505 = vrot.lane.b32.xlu1 %v503_v3, %s2825_s15 }
 0x863   :  { %v506_v5 = vpop.permute.xlu1 %505 }
 0x864   :  { %508 = vst.msk [vmem:[#allocation3 + $0x4] sm:$0x3] %vm301_vm2, %v506_v5  ;;  %2383 = vmatmul.mubr.msk.f32.vlgmr.msra.gmra.mxu0 %vm198_vm3, %v506_v5 }
 0x865   :  { %2397 = vmatpush3.msra.mxu0 %v2911_v4  ;;  %2404 = vmatprep.mubr.msk.f32.mxu0 %vm2823_vm0, %v2822_v0 }
 0x866   :  { %2398 = vmatprep.subr.mxu0 %v2822_v0 }
 0x867   :  { %2399 = vmatpush3.msra.mxu0 %v2920_v6 }
 0x868   :  { %2400 = vmatprep.subr.mxu0 %v2822_v0 }
 0x869   :  { %2401 = vmatpush3.msra.mxu0 %v2933_v7 }
 0x86a   :  { %2402 = vmatprep.subr.mxu0 %v2822_v0 }
 0x86b   :  { %2403 = vmatpush3.msra.mxu0 %v2942_v8 }
 0x86c   :  { %2418 = vmatprep.subr.mxu0 %v2822_v0 }
 0x924   :  { %v578_v10 = vpop.f32.mrf.mxu0 }
 0x925   :  { %v582_v11 = vadd.f32 %v578_v10, %v509_v9 }
 0x926   :  { %v2384_v12 = vpop.f32.mrf.mxu0 }
 0x927   :  { %2593 = vtanh.f32 %v582_v11  ;;  %v2195_v14 = vmul.f32 -1.442695, %v582_v11 }
 0x929   :  { %2595 = vpow2.f32 %v2195_v14 }
 0x934   :  { %v2594_v13 = vpop.eup %2593 }
 0x935   :  { %592 = vrot.lane.b32.xlu0 %v2594_v13, %s2824_s2 }
 0x936   :  { %v2596_v15 = vpop.eup %2595 }
 0x937   :  { %v586_v16 = vadd.f32 1.0, %v2596_v15 }
 0x939   :  { %2597 = vrcp.f32 %v586_v16 }
 0x946   :  { %v2598_v17 = vpop.eup %2597 }
 0x947   :  { %v590_v20 = vmul.f32 %v2598_v17, %v497_v63 }
 0x9a7   :  { %v593_v18 = vpop.permute.xlu0 %592 }
 0x9a8   :  { %v595_v19 = vmul.f32 %v2598_v17, %v593_v18 }
 0x9aa   :  { %597 = vrot.lane.b32.xlu1 %v595_v19, %s2825_s15  ;;  %v921_v19 = vld [vmem:[#allocation2 + $0xe] sm:$0x3] }
 0xa1c   :  { %v598_v21 = vpop.permute.xlu1 %597 }
 0xa1d   :  { %v600_v22 = vadd.f32 %v598_v21, %v590_v20 }
 0xa1f   :  { %2599 = vtanh.f32 %v600_v22 }
 0xa2c   :  { %v2600_v23 = vpop.eup %2599 }
 0xa2d   :  { %603 = vrot.lane.b32.xlu0 %v2600_v23, %s2824_s2 }
 0xa9f   :  { %v604_v24 = vpop.permute.xlu0 %603 }
 0xaa0   :  { %v606_v25 = vmul.f32 %v2598_v17, %v604_v24 }
 0xaa2   :  { %608 = vrot.lane.b32.xlu1 %v606_v25, %s2825_s15 }
 0xb14   :  { %v609_v26 = vpop.permute.xlu1 %608 }
 0xb15   :  { %611 = vst.msk [vmem:[#allocation3 + $0x6] sm:$0x3] %vm301_vm2, %v609_v26  ;;  %2394 = vmatmul.mubr.msk.f32.vlgmr.msra.gmra.mxu1 %vm198_vm3, %v609_v26 }
 0xb16   :  { %2408 = vmatpush3.msra.mxu1 %v2911_v4  ;;  %2415 = vmatprep.mubr.msk.f32.mxu1 %vm2823_vm0, %v2822_v0 }
 0xb17   :  { %2409 = vmatprep.subr.mxu1 %v2822_v0 }
 0xb18   :  { %2410 = vmatpush3.msra.mxu1 %v2920_v6 }
 0xb19   :  { %2411 = vmatprep.subr.mxu1 %v2822_v0 }
 0xb1a   :  { %2412 = vmatpush3.msra.mxu1 %v2933_v7 }
 0xb1b   :  { %2413 = vmatprep.subr.mxu1 %v2822_v0 }
 0xb1c   :  { %2414 = vmatpush3.msra.mxu1 %v2942_v8  ;;  %v1024_v59 = vld [vmem:[#allocation3] sm:$0xff] }
 0xbd5   :  { %v681_v28 = vpop.f32.mrf.mxu1 }
 0xbd6   :  { %v685_v29 = vadd.f32 %v681_v28, %v612_v27 }
 0xbd7   :  { %v2395_v30 = vpop.f32.mrf.mxu1 }
 0xbd8   :  { %2601 = vtanh.f32 %v685_v29  ;;  %v2197_v32 = vmul.f32 -1.442695, %v685_v29 }
 0xbda   :  { %2603 = vpow2.f32 %v2197_v32 }
 0xbe5   :  { %v2602_v31 = vpop.eup %2601 }
 0xbe6   :  { %695 = vrot.lane.b32.xlu0 %v2602_v31, %s2824_s2 }
 0xbe7   :  { %v2604_v33 = vpop.eup %2603 }
 0xbe8   :  { %v689_v34 = vadd.f32 1.0, %v2604_v33 }
 0xbea   :  { %2605 = vrcp.f32 %v689_v34  ;;  %v1029_v34 = vld [vmem:[%s3269_s4 + $0x18] sm:$0xff] }
 0xbeb   :  { %2429 = vmatprep.subr.mxu1 %v1029_v34 }
 0xbf7   :  { %v2606_v35 = vpop.eup %2605 }
 0xbf8   :  { %v693_v38 = vmul.f32 %v2606_v35, %v600_v22 }
 0xc58   :  { %v696_v36 = vpop.permute.xlu0 %695 }
 0xc59   :  { %v698_v37 = vmul.f32 %v2606_v35, %v696_v36  ;;  %v1027_v36 = vld [vmem:[%s3269_s4 + $0x8] sm:$0xff] }
 0xc5b   :  { %700 = vrot.lane.b32.xlu1 %v698_v37, %s2825_s15  ;;  %v1026_v37 = vld [vmem:[%s3269_s4] sm:$0xff] }
 0xccd   :  { %v701_v39 = vpop.permute.xlu1 %700 }
 0xcce   :  { %v703_v40 = vadd.f32 %v701_v39, %v693_v38  ;;  %v3074_v38 = vld [vmem:[%s3270_s5 + $0x18] sm:$0xff]  ;;  %v3079_v39 = vld [vmem:[%s3270_s5 + $0x10] sm:$0xff] }
 0xcd0   :  { %2607 = vtanh.f32 %v703_v40 }
 0xcdd   :  { %v2608_v41 = vpop.eup %2607 }
 0xcde   :  { %706 = vrot.lane.b32.xlu0 %v2608_v41, %s2824_s2  ;;  %v3087_v41 = vld [vmem:[%s3270_s5 + $0x8] sm:$0xff] }
 0xd50   :  { %v707_v42 = vpop.permute.xlu0 %706 }
 0xd51   :  { %v709_v43 = vmul.f32 %v2606_v35, %v707_v42  ;;  %v1028_v35 = vld [vmem:[%s3269_s4 + $0x10] sm:$0xff] }
 0xd53   :  { %711 = vrot.lane.b32.xlu1 %v709_v43, %s2825_s15  ;;  %v3094_v43 = vld [vmem:[%s3270_s5] sm:$0xff] }
 0xdc5   :  { %v712_v44 = vpop.permute.xlu1 %711 }
 0xdc6   :  { %714 = vst.msk [vmem:[#allocation3 + $0x8] sm:$0x3] %vm301_vm2, %v712_v44  ;;  %2405 = vmatmul.mubr.msk.f32.vlgmr.msra.gmra.mxu0 %vm198_vm3, %v712_v44 }
 0xdc7   :  { %2419 = vmatpush3.msra.mxu0 %v2911_v4  ;;  %2426 = vmatprep.mubr.msk.f32.mxu0 %vm2823_vm0, %v2822_v0 }
 0xdc8   :  { %2420 = vmatprep.subr.mxu0 %v2822_v0 }
 0xdc9   :  { %2421 = vmatpush3.msra.mxu0 %v2920_v6 }
 0xdca   :  { %2422 = vmatprep.subr.mxu0 %v2822_v0 }
 0xdcb   :  { %2423 = vmatpush3.msra.mxu0 %v2933_v7 }
 0xdcc   :  { %2424 = vmatprep.subr.mxu0 %v2822_v0 }
 0xdcd   :  { %2425 = vmatpush3.msra.mxu0 %v2942_v8 }
 0xdce   :  { %2440 = vmatprep.subr.mxu0 %v2822_v0 }
 0xe86   :  { %v784_v46 = vpop.f32.mrf.mxu0 }
 0xe87   :  { %v788_v4 = vadd.f32 %v784_v46, %v715_v45 }
 0xe88   :  { %v2406_v47 = vpop.f32.mrf.mxu0 }
 0xe89   :  { %2609 = vtanh.f32 %v788_v4  ;;  %v2199_v49 = vmul.f32 -1.442695, %v788_v4  ;;  %v2204_v47 = vld [vmem:[#allocation9] ss:$0 sm:$0xff] }
 0xe8b   :  { %2611 = vpow2.f32 %v2199_v49 }
 0xe96   :  { %v2610_v48 = vpop.eup %2609 }
 0xe97   :  { %798 = vrot.lane.b32.xlu0 %v2610_v48, %s2824_s2 }
 0xe98   :  { %v2612_v6 = vpop.eup %2611 }
 0xe99   :  { %v792_v50 = vadd.f32 1.0, %v2612_v6 }
 0xe9b   :  { %2613 = vrcp.f32 %v792_v50 }
 0xea8   :  { %v2614_v7 = vpop.eup %2613 }
 0xea9   :  { %v796_v8 = vmul.f32 %v2614_v7, %v703_v40 }
 0xf09   :  { %v799_v51 = vpop.permute.xlu0 %798 }
 0xf0a   :  { %v801_v52 = vmul.f32 %v2614_v7, %v799_v51 }
 0xf0c   :  { %803 = vrot.lane.b32.xlu1 %v801_v52, %s2825_s15 }
 0xf7e   :  { %v804_v53 = vpop.permute.xlu1 %803 }
 0xf7f   :  { %v806_v54 = vadd.f32 %v804_v53, %v796_v8 }
 0xf81   :  { %2615 = vtanh.f32 %v806_v54 }
 0xf8e   :  { %v2616_v55 = vpop.eup %2615 }
 0xf8f   :  { %809 = vrot.lane.b32.xlu0 %v2616_v55, %s2824_s2 }
0x1001   :  { %v810_v56 = vpop.permute.xlu0 %809 }
0x1002   :  { %v812_v57 = vmul.f32 %v2614_v7, %v810_v56 }
0x1004   :  { %814 = vrot.lane.b32.xlu1 %v812_v57, %s2825_s15 }
0x1076   :  { %v815_v58 = vpop.permute.xlu1 %814 }
0x1077   :  { %817 = vst.msk [vmem:[#allocation3 + $0xa] sm:$0x3] %vm301_vm2, %v815_v58  ;;  %2416 = vmatmul.mubr.msk.f32.vlgmr.msra.gmra.mxu1 %vm198_vm3, %v815_v58 }
0x1078   :  { %2437 = vmatprep.mubr.msk.f32.mxu1 %vm198_vm3, %v1024_v59  ;;  %2430 = vmatpush3.msra.mxu1 %v1029_v34 }
0x1079   :  { %2431 = vmatprep.subr.mxu1 %v1028_v35 }
0x107a   :  { %2432 = vmatpush3.msra.mxu1 %v1028_v35 }
0x107b   :  { %2433 = vmatprep.subr.mxu1 %v1027_v36 }
0x107c   :  { %2434 = vmatpush3.msra.mxu1 %v1027_v36 }
0x107d   :  { %2435 = vmatprep.subr.mxu1 %v1026_v37 }
0x107e   :  { %2436 = vmatpush3.msra.mxu1 %v1026_v37 }
0x107f   :  { %2451 = vmatprep.subr.mxu1 %v2822_v0 }
0x1137   :  { %v887_v61 = vpop.f32.mrf.mxu1 }
0x1138   :  { %v891_v62 = vadd.f32 %v887_v61, %v818_v60 }
0x1139   :  { %v2417_v63 = vpop.f32.mrf.mxu1 }
0x113a   :  { %2617 = vtanh.f32 %v891_v62  ;;  %v2201_v2 = vmul.f32 -1.442695, %v891_v62 }
0x113c   :  { %2619 = vpow2.f32 %v2201_v2 }
0x1147   :  { %v2618_v1 = vpop.eup %2617 }
0x1148   :  { %901 = vrot.lane.b32.xlu0 %v2618_v1, %s2824_s2 }
0x1149   :  { %v2620_v3 = vpop.eup %2619 }
0x114a   :  { %v895_v5 = vadd.f32 1.0, %v2620_v3 }
0x114c   :  { %2621 = vrcp.f32 %v895_v5 }
0x1159   :  { %v2622_v9 = vpop.eup %2621 }
0x115a   :  { %v899_v12 = vmul.f32 %v2622_v9, %v806_v54 }
0x11ba   :  { %v902_v10 = vpop.permute.xlu0 %901 }
0x11bb   :  { %v904_v11 = vmul.f32 %v2622_v9, %v902_v10 }
0x11bd   :  { %906 = vrot.lane.b32.xlu1 %v904_v11, %s2825_s15 }
0x122f   :  { %v907_v13 = vpop.permute.xlu1 %906 }
0x1230   :  { %v909_v14 = vadd.f32 %v907_v13, %v899_v12 }
0x1232   :  { %2623 = vtanh.f32 %v909_v14 }
0x123f   :  { %v2624_v15 = vpop.eup %2623 }
0x1240   :  { %912 = vrot.lane.b32.xlu0 %v2624_v15, %s2824_s2 }
0x12b2   :  { %v913_v16 = vpop.permute.xlu0 %912 }
0x12b3   :  { %v915_v17 = vmul.f32 %v2622_v9, %v913_v16 }
0x12b5   :  { %917 = vrot.lane.b32.xlu1 %v915_v17, %s2825_s15 }
0x1327   :  { %v918_v18 = vpop.permute.xlu1 %917 }
0x1328   :  { %920 = vst.msk [vmem:[#allocation3 + $0xc] sm:$0x3] %vm301_vm2, %v918_v18  ;;  %2427 = vmatmul.mubr.msk.f32.vlgmr.msra.gmra.mxu0 %vm198_vm3, %v918_v18 }
0x1329   :  { %2448 = vmatprep.mubr.msk.f32.mxu0 %vm2823_vm0, %v2822_v0  ;;  %2441 = vmatpush3.msra.mxu0 %v3074_v38 }
0x132a   :  { %2442 = vmatprep.subr.mxu0 %v2822_v0 }
0x132b   :  { %2443 = vmatpush3.msra.mxu0 %v3079_v39 }
0x132c   :  { %2444 = vmatprep.subr.mxu0 %v2822_v0 }
0x132d   :  { %2445 = vmatpush3.msra.mxu0 %v3087_v41 }
0x132e   :  { %2446 = vmatprep.subr.mxu0 %v2822_v0 }
0x132f   :  { %2447 = vmatpush3.msra.mxu0 %v3094_v43 }
0x1330   :  { %2449 = vmatmul.mubr.f32.vlgmr.msra.gmra.mxu0 %v2822_v0  ;;  %2462 = vmatprep.subr.mxu0 %v2822_v0 }
0x1331   :  { %2463 = vmatpush3.msra.mxu0 %v3074_v38  ;;  %2470 = vmatprep.mubr.msk.f32.mxu0 %vm2823_vm0, %v2822_v0 }
0x1332   :  { %2464 = vmatprep.subr.mxu0 %v2822_v0 }
0x1333   :  { %2465 = vmatpush3.msra.mxu0 %v3079_v39 }
0x1334   :  { %2466 = vmatprep.subr.mxu0 %v2822_v0 }
0x1335   :  { %2467 = vmatpush3.msra.mxu0 %v3087_v41 }
0x1336   :  { %2468 = vmatprep.subr.mxu0 %v2822_v0 }
0x1337   :  { %2469 = vmatpush3.msra.mxu0 %v3094_v43 }
0x1338   :  { %2484 = vmatprep.subr.mxu0 %v2822_v0 }
0x13e8   :  { %v990_v20 = vpop.f32.mrf.mxu0 }
0x13e9   :  { %v994_v21 = vadd.f32 %v990_v20, %v921_v19 }
0x13ea   :  { %v2428_v22 = vpop.f32.mrf.mxu0 }
0x13eb   :  { %2625 = vtanh.f32 %v994_v21  ;;  %v2203_v24 = vmul.f32 -1.442695, %v994_v21 }
0x13ed   :  { %2627 = vpow2.f32 %v2203_v24 }
0x13f0   :  { %v1191_v46 = vpop.f32.mrf.mxu0 }
0x13f2   :  { %v2450_v4 = vpop.f32.mrf.mxu0 }
0x13f8   :  { %v2626_v23 = vpop.eup %2625 }
0x13f9   :  { %1004 = vrot.lane.b32.xlu0 %v2626_v23, %s2824_s2 }
0x13fa   :  { %v2628_v25 = vpop.eup %2627 }
0x13fb   :  { %v998_v26 = vadd.f32 1.0, %v2628_v25 }
0x13fd   :  { %2629 = vrcp.f32 %v998_v26 }
0x140a   :  { %v2630_v27 = vpop.eup %2629 }
0x140b   :  { %v1002_v30 = vmul.f32 %v2630_v27, %v909_v14 }
0x146b   :  { %v1005_v28 = vpop.permute.xlu0 %1004 }
0x146c   :  { %v1007_v29 = vmul.f32 %v2630_v27, %v1005_v28 }
0x146e   :  { %1009 = vrot.lane.b32.xlu1 %v1007_v29, %s2825_s15 }
0x14e0   :  { %v1010_v31 = vpop.permute.xlu1 %1009 }
0x14e1   :  { %v1012_v32 = vadd.f32 %v1010_v31, %v1002_v30 }
0x14e3   :  { %2631 = vtanh.f32 %v1012_v32 }
0x14f0   :  { %v2632_v33 = vpop.eup %2631 }
0x14f1   :  { %1015 = vrot.lane.b32.xlu0 %v2632_v33, %s2824_s2 }
0x1563   :  { %v1016_v40 = vpop.permute.xlu0 %1015 }
0x1564   :  { %v1018_v42 = vmul.f32 %v2630_v27, %v1016_v40 }
0x1566   :  { %1020 = vrot.lane.b32.xlu1 %v1018_v42, %s2825_s15 }
0x15d8   :  { %v1021_v44 = vpop.permute.xlu1 %1020 }
0x15d9   :  { %1023 = vst.msk [vmem:[#allocation3 + $0xe] sm:$0x3] %vm301_vm2, %v1021_v44 }
0x15e0   :  { %v1025_v45 = vld [vmem:[#allocation3 + $0x8] sm:$0xff] }
0x15e1   :  { %2438 = vmatmul.mubr.msk.f32.vlgmr.msra.gmra.mxu1 %vm198_vm3, %v1025_v45 }
0x15e2   :  { %2452 = vmatpush3.msra.mxu1 %v3074_v38  ;;  %2459 = vmatprep.mubr.msk.f32.mxu1 %vm2823_vm0, %v2822_v0 }
0x15e3   :  { %2453 = vmatprep.subr.mxu1 %v2822_v0 }
0x15e4   :  { %2454 = vmatpush3.msra.mxu1 %v3079_v39 }
0x15e5   :  { %2455 = vmatprep.subr.mxu1 %v2822_v0 }
0x15e6   :  { %2456 = vmatpush3.msra.mxu1 %v3087_v41 }
0x15e7   :  { %2457 = vmatprep.subr.mxu1 %v2822_v0 }
0x15e8   :  { %2458 = vmatpush3.msra.mxu1 %v3094_v43 }
0x15e9   :  { %2473 = vmatprep.subr.mxu1 %v2822_v0 }
0x16a1   :  { %v2439_v48 = vpop.f32.mrf.mxu1 }
0x16a2   :  { %v1115_v49 = vadd.f32 %v2439_v48, %v2204_v47 }
0x16a3   :  { %v1109_v6 = vpop.f32.mrf.mxu1 }
0x16a4   :  { %1119 = vst [vmem:[#allocation2 + $0x8] sm:$0xff] %v1115_v49  ;;  %v1110_v50 = vadd.f32 %v2204_v47, %v1109_v6 }
0x16a6   :  { %1118 = vst [vmem:[#allocation2] sm:$0xff] %v1110_v50 }
0x16ad   :  { %v1124_v7 = vld [vmem:[#allocation2] sm:$0x3]  ;;  %v1225_v2 = vld [vmem:[#allocation2 + $0x2] sm:$0x3]  ;;  %v1328_v24 = vld [vmem:[#allocation2 + $0x4] sm:$0x3] }
0x16ae   :  { %v1195_v51 = vadd.f32 %v1191_v46, %v1124_v7  ;;  %v1431_v46 = vld [vmem:[#allocation2 + $0x6] sm:$0x3] }
0x16b0   :  { %2633 = vtanh.f32 %v1195_v51  ;;  %v2207_v8 = vmul.f32 -1.442695, %v1195_v51 }
0x16b2   :  { %2635 = vpow2.f32 %v2207_v8 }
0x16bd   :  { %v2634_v52 = vpop.eup %2633 }
0x16be   :  { %1205 = vrot.lane.b32.xlu0 %v2634_v52, %s2824_s2 }
0x16bf   :  { %v2636_v53 = vpop.eup %2635 }
0x16c0   :  { %v1199_v54 = vadd.f32 1.0, %v2636_v53 }
0x16c2   :  { %2637 = vrcp.f32 %v1199_v54 }
0x16cf   :  { %v2638_v55 = vpop.eup %2637 }
0x16d0   :  { %v1203_v58 = vmul.f32 0.0, %v2638_v55 }
0x1730   :  { %v1206_v56 = vpop.permute.xlu0 %1205 }
0x1731   :  { %v1208_v57 = vmul.f32 %v2638_v55, %v1206_v56 }
0x1733   :  { %1210 = vrot.lane.b32.xlu1 %v1208_v57, %s2825_s15 }
0x17a5   :  { %v1211_v59 = vpop.permute.xlu1 %1210 }
0x17a6   :  { %v1213_v60 = vadd.f32 %v1211_v59, %v1203_v58 }
0x17a8   :  { %2639 = vtanh.f32 %v1213_v60 }
0x17b5   :  { %v2640_v61 = vpop.eup %2639 }
0x17b6   :  { %1216 = vrot.lane.b32.xlu0 %v2640_v61, %s2824_s2 }
0x1828   :  { %v1217_v62 = vpop.permute.xlu0 %1216 }
0x1829   :  { %v1219_v63 = vmul.f32 %v2638_v55, %v1217_v62 }
0x182b   :  { %1221 = vrot.lane.b32.xlu1 %v1219_v63, %s2825_s15 }
0x189d   :  { %v1222_v1 = vpop.permute.xlu1 %1221 }
0x189e   :  { %1224 = vst.msk [vmem:[#allocation4] sm:$0x3] %vm301_vm2, %v1222_v1  ;;  %2460 = vmatmul.mubr.msk.f32.vlgmr.msra.gmra.mxu1 %vm198_vm3, %v1222_v1 }
0x189f   :  { %2474 = vmatpush3.msra.mxu1 %v3074_v38  ;;  %2481 = vmatprep.mubr.msk.f32.mxu1 %vm2823_vm0, %v2822_v0 }
0x18a0   :  { %2475 = vmatprep.subr.mxu1 %v2822_v0 }
0x18a1   :  { %2476 = vmatpush3.msra.mxu1 %v3079_v39 }
0x18a2   :  { %2477 = vmatprep.subr.mxu1 %v2822_v0 }
0x18a3   :  { %2478 = vmatpush3.msra.mxu1 %v3087_v41 }
0x18a4   :  { %2479 = vmatprep.subr.mxu1 %v2822_v0 }
0x18a5   :  { %2480 = vmatpush3.msra.mxu1 %v3094_v43 }
0x18a6   :  { %2495 = vmatprep.subr.mxu1 %v2822_v0 }
0x195e   :  { %v1294_v3 = vpop.f32.mrf.mxu1 }
0x195f   :  { %v1298_v5 = vadd.f32 %v1294_v3, %v1225_v2 }
0x1960   :  { %v2461_v9 = vpop.f32.mrf.mxu1 }
0x1961   :  { %2641 = vtanh.f32 %v1298_v5  ;;  %v2209_v11 = vmul.f32 -1.442695, %v1298_v5 }
0x1963   :  { %2643 = vpow2.f32 %v2209_v11 }
0x196e   :  { %v2642_v10 = vpop.eup %2641 }
0x196f   :  { %1308 = vrot.lane.b32.xlu0 %v2642_v10, %s2824_s2 }
0x1970   :  { %v2644_v12 = vpop.eup %2643 }
0x1971   :  { %v1302_v13 = vadd.f32 1.0, %v2644_v12 }
0x1973   :  { %2645 = vrcp.f32 %v1302_v13 }
0x1980   :  { %v2646_v14 = vpop.eup %2645 }
0x1981   :  { %v1306_v17 = vmul.f32 %v2646_v14, %v1213_v60  ;;  %v1534_v60 = vld [vmem:[#allocation2 + $0x8] sm:$0x3] }
0x19e1   :  { %v1309_v15 = vpop.permute.xlu0 %1308 }
0x19e2   :  { %v1311_v16 = vmul.f32 %v2646_v14, %v1309_v15 }
0x19e4   :  { %1313 = vrot.lane.b32.xlu1 %v1311_v16, %s2825_s15 }
0x1a56   :  { %v1314_v18 = vpop.permute.xlu1 %1313 }
0x1a57   :  { %v1316_v19 = vadd.f32 %v1314_v18, %v1306_v17 }
0x1a59   :  { %2647 = vtanh.f32 %v1316_v19 }
0x1a66   :  { %v2648_v20 = vpop.eup %2647 }
0x1a67   :  { %1319 = vrot.lane.b32.xlu0 %v2648_v20, %s2824_s2 }
0x1ad9   :  { %v1320_v21 = vpop.permute.xlu0 %1319 }
0x1ada   :  { %v1322_v22 = vmul.f32 %v2646_v14, %v1320_v21 }
0x1adc   :  { %1324 = vrot.lane.b32.xlu1 %v1322_v22, %s2825_s15 }
0x1b4e   :  { %v1325_v23 = vpop.permute.xlu1 %1324 }
0x1b4f   :  { %1327 = vst.msk [vmem:[#allocation4 + $0x2] sm:$0x3] %vm301_vm2, %v1325_v23  ;;  %2471 = vmatmul.mubr.msk.f32.vlgmr.msra.gmra.mxu0 %vm198_vm3, %v1325_v23 }
0x1b50   :  { %2485 = vmatpush3.msra.mxu0 %v3074_v38  ;;  %2492 = vmatprep.mubr.msk.f32.mxu0 %vm2823_vm0, %v2822_v0 }
0x1b51   :  { %2486 = vmatprep.subr.mxu0 %v2822_v0 }
0x1b52   :  { %2487 = vmatpush3.msra.mxu0 %v3079_v39 }
0x1b53   :  { %2488 = vmatprep.subr.mxu0 %v2822_v0 }
0x1b54   :  { %2489 = vmatpush3.msra.mxu0 %v3087_v41 }
0x1b55   :  { %2490 = vmatprep.subr.mxu0 %v2822_v0 }
0x1b56   :  { %2491 = vmatpush3.msra.mxu0 %v3094_v43 }
0x1b57   :  { %2506 = vmatprep.subr.mxu0 %v2822_v0 }
0x1c0f   :  { %v1397_v25 = vpop.f32.mrf.mxu0 }
0x1c10   :  { %v1401_v26 = vadd.f32 %v1397_v25, %v1328_v24 }
0x1c11   :  { %v2472_v27 = vpop.f32.mrf.mxu0 }
0x1c12   :  { %2649 = vtanh.f32 %v1401_v26  ;;  %v2211_v29 = vmul.f32 -1.442695, %v1401_v26 }
0x1c14   :  { %2651 = vpow2.f32 %v2211_v29 }
0x1c1f   :  { %v2650_v28 = vpop.eup %2649 }
0x1c20   :  { %1411 = vrot.lane.b32.xlu0 %v2650_v28, %s2824_s2 }
0x1c21   :  { %v2652_v30 = vpop.eup %2651 }
0x1c22   :  { %v1405_v31 = vadd.f32 1.0, %v2652_v30 }
0x1c24   :  { %2653 = vrcp.f32 %v1405_v31 }
0x1c31   :  { %v2654_v32 = vpop.eup %2653 }
0x1c32   :  { %v1409_v35 = vmul.f32 %v2654_v32, %v1316_v19  ;;  %v1637_v19 = vld [vmem:[#allocation2 + $0xa] sm:$0x3] }
0x1c92   :  { %v1412_v33 = vpop.permute.xlu0 %1411 }
0x1c93   :  { %v1414_v34 = vmul.f32 %v2654_v32, %v1412_v33  ;;  %v1740_v33 = vld [vmem:[#allocation2 + $0xc] sm:$0x3] }
0x1c95   :  { %1416 = vrot.lane.b32.xlu1 %v1414_v34, %s2825_s15 }
0x1d07   :  { %v1417_v36 = vpop.permute.xlu1 %1416 }
0x1d08   :  { %v1419_v37 = vadd.f32 %v1417_v36, %v1409_v35 }
0x1d0a   :  { %2655 = vtanh.f32 %v1419_v37 }
0x1d17   :  { %v2656_v40 = vpop.eup %2655 }
0x1d18   :  { %1422 = vrot.lane.b32.xlu0 %v2656_v40, %s2824_s2 }
0x1d8a   :  { %v1423_v42 = vpop.permute.xlu0 %1422 }
0x1d8b   :  { %v1425_v44 = vmul.f32 %v2654_v32, %v1423_v42 }
0x1d8d   :  { %1427 = vrot.lane.b32.xlu1 %v1425_v44, %s2825_s15 }
0x1dff   :  { %v1428_v45 = vpop.permute.xlu1 %1427 }
0x1e00   :  { %1430 = vst.msk [vmem:[#allocation4 + $0x4] sm:$0x3] %vm301_vm2, %v1428_v45  ;;  %2482 = vmatmul.mubr.msk.f32.vlgmr.msra.gmra.mxu1 %vm198_vm3, %v1428_v45 }
0x1e01   :  { %2496 = vmatpush3.msra.mxu1 %v3074_v38  ;;  %2503 = vmatprep.mubr.msk.f32.mxu1 %vm2823_vm0, %v2822_v0 }
0x1e02   :  { %2497 = vmatprep.subr.mxu1 %v2822_v0 }
0x1e03   :  { %2498 = vmatpush3.msra.mxu1 %v3079_v39 }
0x1e04   :  { %2499 = vmatprep.subr.mxu1 %v2822_v0 }
0x1e05   :  { %2500 = vmatpush3.msra.mxu1 %v3087_v41 }
0x1e06   :  { %2501 = vmatprep.subr.mxu1 %v2822_v0 }
0x1e07   :  { %2502 = vmatpush3.msra.mxu1 %v3094_v43 }
0x1e08   :  { %2517 = vmatprep.subr.mxu1 %v2822_v0 }
0x1ec0   :  { %v1500_v4 = vpop.f32.mrf.mxu1 }
0x1ec1   :  { %v1504_v47 = vadd.f32 %v1500_v4, %v1431_v46 }
0x1ec2   :  { %v2483_v48 = vpop.f32.mrf.mxu1 }
0x1ec3   :  { %2657 = vtanh.f32 %v1504_v47  ;;  %v2213_v6 = vmul.f32 -1.442695, %v1504_v47 }
0x1ec5   :  { %2659 = vpow2.f32 %v2213_v6 }
0x1ed0   :  { %v2658_v49 = vpop.eup %2657 }
0x1ed1   :  { %1514 = vrot.lane.b32.xlu0 %v2658_v49, %s2824_s2 }
0x1ed2   :  { %v2660_v50 = vpop.eup %2659 }
0x1ed3   :  { %v1508_v7 = vadd.f32 1.0, %v2660_v50 }
0x1ed5   :  { %2661 = vrcp.f32 %v1508_v7 }
0x1ee2   :  { %v2662_v51 = vpop.eup %2661 }
0x1ee3   :  { %v1512_v53 = vmul.f32 %v2662_v51, %v1419_v37 }
0x1f43   :  { %v1515_v52 = vpop.permute.xlu0 %1514 }
0x1f44   :  { %v1517_v8 = vmul.f32 %v2662_v51, %v1515_v52  ;;  %v1843_v52 = vld [vmem:[#allocation2 + $0xe] sm:$0x3] }
0x1f46   :  { %1519 = vrot.lane.b32.xlu1 %v1517_v8, %s2825_s15 }
0x1fb8   :  { %v1520_v54 = vpop.permute.xlu1 %1519 }
0x1fb9   :  { %v1522_v55 = vadd.f32 %v1520_v54, %v1512_v53 }
0x1fbb   :  { %2663 = vtanh.f32 %v1522_v55 }
0x1fc8   :  { %v2664_v56 = vpop.eup %2663 }
0x1fc9   :  { %1525 = vrot.lane.b32.xlu0 %v2664_v56, %s2824_s2 }
0x203b   :  { %v1526_v57 = vpop.permute.xlu0 %1525 }
0x203c   :  { %v1528_v58 = vmul.f32 %v2662_v51, %v1526_v57 }
0x203e   :  { %1530 = vrot.lane.b32.xlu1 %v1528_v58, %s2825_s15 }
0x20b0   :  { %v1531_v59 = vpop.permute.xlu1 %1530 }
0x20b1   :  { %1533 = vst.msk [vmem:[#allocation4 + $0x6] sm:$0x3] %vm301_vm2, %v1531_v59  ;;  %2493 = vmatmul.mubr.msk.f32.vlgmr.msra.gmra.mxu0 %vm198_vm3, %v1531_v59 }
0x20b2   :  { %2507 = vmatpush3.msra.mxu0 %v3074_v38  ;;  %2514 = vmatprep.mubr.msk.f32.mxu0 %vm2823_vm0, %v2822_v0 }
0x20b3   :  { %2508 = vmatprep.subr.mxu0 %v2822_v0 }
0x20b4   :  { %2509 = vmatpush3.msra.mxu0 %v3079_v39 }
0x20b5   :  { %2510 = vmatprep.subr.mxu0 %v2822_v0 }
0x20b6   :  { %2511 = vmatpush3.msra.mxu0 %v3087_v41 }
0x20b7   :  { %2512 = vmatprep.subr.mxu0 %v2822_v0 }
0x20b8   :  { %2513 = vmatpush3.msra.mxu0 %v3094_v43  ;;  %v1946_v32 = vld [vmem:[#allocation4] sm:$0xff] }
0x2171   :  { %v1603_v61 = vpop.f32.mrf.mxu0 }
0x2172   :  { %v1607_v62 = vadd.f32 %v1603_v61, %v1534_v60 }
0x2173   :  { %v2494_v63 = vpop.f32.mrf.mxu0 }
0x2174   :  { %2665 = vtanh.f32 %v1607_v62  ;;  %v2215_v2 = vmul.f32 -1.442695, %v1607_v62 }
0x2176   :  { %2667 = vpow2.f32 %v2215_v2 }
0x2181   :  { %v2666_v1 = vpop.eup %2665 }
0x2182   :  { %1617 = vrot.lane.b32.xlu0 %v2666_v1, %s2824_s2 }
0x2183   :  { %v2668_v3 = vpop.eup %2667 }
0x2184   :  { %v1611_v5 = vadd.f32 1.0, %v2668_v3  ;;  %v1951_v3 = vld [vmem:[%s3272_s7 + $0x18] sm:$0xff] }
0x2185   :  { %2528 = vmatprep.subr.mxu0 %v1951_v3 }
0x2186   :  { %2669 = vrcp.f32 %v1611_v5  ;;  %v1950_v5 = vld [vmem:[%s3272_s7 + $0x10] sm:$0xff] }
0x2193   :  { %v2670_v9 = vpop.eup %2669 }
0x2194   :  { %v1615_v12 = vmul.f32 %v2670_v9, %v1522_v55 }
0x21f4   :  { %v1618_v10 = vpop.permute.xlu0 %1617 }
0x21f5   :  { %v1620_v11 = vmul.f32 %v2670_v9, %v1618_v10  ;;  %v1948_v10 = vld [vmem:[%s3272_s7] sm:$0xff] }
0x21f7   :  { %1622 = vrot.lane.b32.xlu1 %v1620_v11, %s2825_s15 }
0x2269   :  { %v1623_v13 = vpop.permute.xlu1 %1622 }
0x226a   :  { %v1625_v14 = vadd.f32 %v1623_v13, %v1615_v12 }
0x226c   :  { %2671 = vtanh.f32 %v1625_v14 }
0x2279   :  { %v2672_v15 = vpop.eup %2671 }
0x227a   :  { %1628 = vrot.lane.b32.xlu0 %v2672_v15, %s2824_s2  ;;  %v2087_v15 = vld [vmem:[%s3274_s9 + $0x38] sm:$0xff] }
0x22ec   :  { %v1629_v16 = vpop.permute.xlu0 %1628 }
0x22ed   :  { %v1631_v17 = vmul.f32 %v2670_v9, %v1629_v16  ;;  %v1949_v9 = vld [vmem:[%s3272_s7 + $0x8] sm:$0xff]  ;;  %v2086_v16 = vld [vmem:[%s3274_s9 + $0x30] sm:$0xff] }
0x22ef   :  { %1633 = vrot.lane.b32.xlu1 %v1631_v17, %s2825_s15  ;;  %v2085_v17 = vld [vmem:[%s3274_s9 + $0x28] sm:$0xff] }
0x2361   :  { %v1634_v18 = vpop.permute.xlu1 %1633 }
0x2362   :  { %1636 = vst.msk [vmem:[#allocation4 + $0x8] sm:$0x3] %vm301_vm2, %v1634_v18  ;;  %2504 = vmatmul.mubr.msk.f32.vlgmr.msra.gmra.mxu1 %vm198_vm3, %v1634_v18  ;;  %v2084_v18 = vld [vmem:[%s3274_s9 + $0x20] sm:$0xff] }
0x2363   :  { %2518 = vmatpush3.msra.mxu1 %v3074_v38  ;;  %2525 = vmatprep.mubr.msk.f32.mxu1 %vm2823_vm0, %v2822_v0 }
0x2364   :  { %2519 = vmatprep.subr.mxu1 %v2822_v0 }
0x2365   :  { %2520 = vmatpush3.msra.mxu1 %v3079_v39 }
0x2366   :  { %2521 = vmatprep.subr.mxu1 %v2822_v0 }
0x2367   :  { %2522 = vmatpush3.msra.mxu1 %v3087_v41 }
0x2368   :  { %2523 = vmatprep.subr.mxu1 %v2822_v0 }
0x2369   :  { %2524 = vmatpush3.msra.mxu1 %v3094_v43 }
0x236a   :  { %2539 = vmatprep.subr.mxu1 %v2087_v15 }
0x2422   :  { %v1706_v20 = vpop.f32.mrf.mxu1 }
0x2423   :  { %v1710_v21 = vadd.f32 %v1706_v20, %v1637_v19  ;;  %v2083_v19 = vld [vmem:[%s3274_s9 + $0x18] sm:$0xff]  ;;  %v2082_v20 = vld [vmem:[%s3274_s9 + $0x10] sm:$0xff] }
0x2424   :  { %v2505_v22 = vpop.f32.mrf.mxu1 }
0x2425   :  { %2673 = vtanh.f32 %v1710_v21  ;;  %v2217_v23 = vmul.f32 -1.442695, %v1710_v21  ;;  %v2081_v21 = vld [vmem:[%s3274_s9 + $0x8] sm:$0xff]  ;;  %v2080_v22 = vld [vmem:[%s3274_s9] sm:$0xff] }
0x2427   :  { %2675 = vpow2.f32 %v2217_v23 }
0x2432   :  { %v2674_v38 = vpop.eup %2673 }
0x2433   :  { %1720 = vrot.lane.b32.xlu0 %v2674_v38, %s2824_s2  ;;  %v2222_v38 = vld [vmem:[#allocation10] ss:$0 sm:$0xff] }
0x2434   :  { %v2676_v24 = vpop.eup %2675 }
0x2435   :  { %v1714_v39 = vadd.f32 1.0, %v2676_v24 }
0x2437   :  { %2677 = vrcp.f32 %v1714_v39 }
0x2444   :  { %v2678_v25 = vpop.eup %2677 }
0x2445   :  { %v1718_v0 = vmul.f32 %v2678_v25, %v1625_v14 }
0x24a5   :  { %v1721_v26 = vpop.permute.xlu0 %1720 }
0x24a6   :  { %v1723_v41 = vmul.f32 %v2678_v25, %v1721_v26 }
0x24a8   :  { %1725 = vrot.lane.b32.xlu1 %v1723_v41, %s2825_s15 }
0x251a   :  { %v1726_v43 = vpop.permute.xlu1 %1725 }
0x251b   :  { %v1728_v27 = vadd.f32 %v1726_v43, %v1718_v0 }
0x251d   :  { %2679 = vtanh.f32 %v1728_v27 }
0x252a   :  { %v2680_v28 = vpop.eup %2679 }
0x252b   :  { %1731 = vrot.lane.b32.xlu0 %v2680_v28, %s2824_s2 }
0x259d   :  { %v1732_v29 = vpop.permute.xlu0 %1731 }
0x259e   :  { %v1734_v30 = vmul.f32 %v2678_v25, %v1732_v29 }
0x25a0   :  { %1736 = vrot.lane.b32.xlu1 %v1734_v30, %s2825_s15 }
0x2612   :  { %v1737_v31 = vpop.permute.xlu1 %1736 }
0x2613   :  { %1739 = vst.msk [vmem:[#allocation4 + $0xa] sm:$0x3] %vm301_vm2, %v1737_v31  ;;  %2515 = vmatmul.mubr.msk.f32.vlgmr.msra.gmra.mxu0 %vm198_vm3, %v1737_v31 }
0x2614   :  { %2536 = vmatprep.mubr.msk.f32.mxu0 %vm198_vm3, %v1946_v32  ;;  %2529 = vmatpush3.msra.mxu0 %v1951_v3 }
0x2615   :  { %2530 = vmatprep.subr.mxu0 %v1950_v5 }
0x2616   :  { %2531 = vmatpush3.msra.mxu0 %v1950_v5 }
0x2617   :  { %2532 = vmatprep.subr.mxu0 %v1949_v9 }
0x2618   :  { %2533 = vmatpush3.msra.mxu0 %v1949_v9 }
0x2619   :  { %2534 = vmatprep.subr.mxu0 %v1948_v10 }
0x261a   :  { %2535 = vmatpush3.msra.mxu0 %v1948_v10 }
0x26d3   :  { %v1809_v34 = vpop.f32.mrf.mxu0 }
0x26d4   :  { %v1813_v35 = vadd.f32 %v1809_v34, %v1740_v33 }
0x26d5   :  { %v2516_v36 = vpop.f32.mrf.mxu0 }
0x26d6   :  { %2681 = vtanh.f32 %v1813_v35  ;;  %v2219_v40 = vmul.f32 -1.442695, %v1813_v35 }
0x26d8   :  { %2683 = vpow2.f32 %v2219_v40 }
0x26e3   :  { %v2682_v37 = vpop.eup %2681 }
0x26e4   :  { %1823 = vrot.lane.b32.xlu0 %v2682_v37, %s2824_s2 }
0x26e5   :  { %v2684_v42 = vpop.eup %2683 }
0x26e6   :  { %v1817_v44 = vadd.f32 1.0, %v2684_v42 }
0x26e8   :  { %2685 = vrcp.f32 %v1817_v44 }
0x26f5   :  { %v2686_v45 = vpop.eup %2685 }
0x26f6   :  { %v1821_v47 = vmul.f32 %v2686_v45, %v1728_v27 }
0x2756   :  { %v1824_v46 = vpop.permute.xlu0 %1823 }
0x2757   :  { %v1826_v4 = vmul.f32 %v2686_v45, %v1824_v46 }
0x2759   :  { %1828 = vrot.lane.b32.xlu1 %v1826_v4, %s2825_s15 }
0x27cb   :  { %v1829_v48 = vpop.permute.xlu1 %1828 }
0x27cc   :  { %v1831_v49 = vadd.f32 %v1829_v48, %v1821_v47 }
0x27ce   :  { %2687 = vtanh.f32 %v1831_v49 }
0x27db   :  { %v2688_v6 = vpop.eup %2687 }
0x27dc   :  { %1834 = vrot.lane.b32.xlu0 %v2688_v6, %s2824_s2 }
0x284e   :  { %v1835_v50 = vpop.permute.xlu0 %1834 }
0x284f   :  { %v1837_v7 = vmul.f32 %v2686_v45, %v1835_v50 }
0x2851   :  { %1839 = vrot.lane.b32.xlu1 %v1837_v7, %s2825_s15 }
0x28c3   :  { %v1840_v51 = vpop.permute.xlu1 %1839 }
0x28c4   :  { %1842 = vst.msk [vmem:[#allocation4 + $0xc] sm:$0x3] %vm301_vm2, %v1840_v51  ;;  %2526 = vmatmul.mubr.msk.f32.vlgmr.msra.gmra.mxu1 %vm198_vm3, %v1840_v51 }
0x28c5   :  { %2540 = vmatpush3.msra.mxu1 %v2087_v15 }
0x28c6   :  { %2541 = vmatprep.subr.mxu1 %v2086_v16 }
0x28c7   :  { %2542 = vmatpush3.msra.mxu1 %v2086_v16 }
0x28c8   :  { %2543 = vmatprep.subr.mxu1 %v2085_v17 }
0x28c9   :  { %2544 = vmatpush3.msra.mxu1 %v2085_v17 }
0x28ca   :  { %2545 = vmatprep.subr.mxu1 %v2084_v18 }
0x28cb   :  { %2546 = vmatpush3.msra.mxu1 %v2084_v18 }
0x28cc   :  { %2547 = vmatprep.subr.mxu1 %v2083_v19 }
0x28cd   :  { %2548 = vmatpush3.msra.mxu1 %v2083_v19 }
0x28ce   :  { %2549 = vmatprep.subr.mxu1 %v2082_v20 }
0x28cf   :  { %2550 = vmatpush3.msra.mxu1 %v2082_v20 }
0x28d0   :  { %2551 = vmatprep.subr.mxu1 %v2081_v21 }
0x28d1   :  { %2552 = vmatpush3.msra.mxu1 %v2081_v21 }
0x28d2   :  { %2553 = vmatprep.subr.mxu1 %v2080_v22 }
0x28d3   :  { %2554 = vmatpush3.msra.mxu1 %v2080_v22 }
0x2984   :  { %v1912_v8 = vpop.f32.mrf.mxu1 }
0x2985   :  { %v1916_v53 = vadd.f32 %v1912_v8, %v1843_v52 }
0x2986   :  { %v2527_v54 = vpop.f32.mrf.mxu1 }
0x2987   :  { %2689 = vtanh.f32 %v1916_v53  ;;  %v2221_v56 = vmul.f32 -1.442695, %v1916_v53 }
0x2989   :  { %2691 = vpow2.f32 %v2221_v56 }
0x2994   :  { %v2690_v55 = vpop.eup %2689 }
0x2995   :  { %1926 = vrot.lane.b32.xlu0 %v2690_v55, %s2824_s2 }
0x2996   :  { %v2692_v57 = vpop.eup %2691 }
0x2997   :  { %v1920_v58 = vadd.f32 1.0, %v2692_v57  ;;  %v2225_v57 = vld [vmem:[#allocation12] ss:$0 sm:$0xff] }
0x2999   :  { %2693 = vrcp.f32 %v1920_v58 }
0x29a6   :  { %v2694_v59 = vpop.eup %2693 }
0x29a7   :  { %v1924_v62 = vmul.f32 %v2694_v59, %v1831_v49 }
0x2a07   :  { %v1927_v60 = vpop.permute.xlu0 %1926 }
0x2a08   :  { %v1929_v61 = vmul.f32 %v2694_v59, %v1927_v60 }
0x2a0a   :  { %1931 = vrot.lane.b32.xlu1 %v1929_v61, %s2825_s15 }
0x2a7c   :  { %v1932_v63 = vpop.permute.xlu1 %1931 }
0x2a7d   :  { %v1934_v1 = vadd.f32 %v1932_v63, %v1924_v62 }
0x2a7f   :  { %2695 = vtanh.f32 %v1934_v1 }
0x2a8c   :  { %v2696_v2 = vpop.eup %2695 }
0x2a8d   :  { %1937 = vrot.lane.b32.xlu0 %v2696_v2, %s2824_s2 }
0x2aff   :  { %v1938_v11 = vpop.permute.xlu0 %1937 }
0x2b00   :  { %v1940_v12 = vmul.f32 %v2694_v59, %v1938_v11 }
0x2b02   :  { %1942 = vrot.lane.b32.xlu1 %v1940_v12, %s2825_s15 }
0x2b74   :  { %v1943_v13 = vpop.permute.xlu1 %1942 }
0x2b75   :  { %1945 = vst.msk [vmem:[#allocation4 + $0xe] sm:$0x3] %vm301_vm2, %v1943_v13 }
0x2b7c   :  { %v1947_v14 = vld [vmem:[#allocation4 + $0x8] sm:$0xff] }
0x2b7d   :  { %2537 = vmatmul.mubr.msk.f32.vlgmr.msra.gmra.mxu0 %vm198_vm3, %v1947_v14 }
0x2c3d   :  { %v2538_v23 = vpop.f32.mrf.mxu0 }
0x2c3e   :  { %v2037_v24 = vadd.f32 %v2538_v23, %v2222_v38 }
0x2c3f   :  { %v2031_v39 = vpop.f32.mrf.mxu0 }
0x2c40   :  { %v2047_v25 = vand.u32 2147483647, %v2037_v24  ;;  %v2032_v26 = vadd.f32 %v2222_v38, %v2031_v39  ;;  %v2041_v4 = vmax.f32 %v2037_v24, 0.0  ;;  %vm2043_vm6 = vcmp.ne.f32.partialorder %v2037_v24, %v2037_v24 }
0x2c42   :  { %v2049_v41 = vsub.f32 0.0, %v2047_v25  ;;  %v2046_v0 = vand.u32 2147483647, %v2032_v26  ;;  %v2040_v50 = vmax.f32 %v2032_v26, 0.0  ;;  %vm2042_vm7 = vcmp.ne.f32.partialorder %v2032_v26, %v2032_v26 }
0x2c44   :  { %v2052_v43 = vmul.f32 1.442695, %v2049_v41  ;;  %v2048_v27 = vsub.f32 0.0, %v2046_v0 }
0x2c46   :  { %2697 = vpow2.f32 %v2052_v43  ;;  %v2050_v28 = vmul.f32 1.442695, %v2048_v27 }
0x2c48   :  { %2699 = vpow2.f32 %v2050_v28 }
0x2c53   :  { %v2698_v29 = vpop.eup %2697 }
0x2c54   :  { %v2063_v30 = vadd.f32 1.0, %v2698_v29  ;;  %v2066_v33 = vmul.f32 -0.5, %v2698_v29  ;;  %v2069_v36 = vand.u32 2147483647, %v2698_v29 }
0x2c55   :  { %v2700_v31 = vpop.eup %2699 }
0x2c56   :  { %2701 = vlog2.f32 %v2063_v30  ;;  %v2054_v32 = vadd.f32 1.0, %v2700_v31  ;;  %v2057_v34 = vmul.f32 -0.5, %v2700_v31  ;;  %v2067_v35 = vadd.f32 1.0, %v2066_v33 }
0x2c57   :  { %v2060_v42 = vand.u32 2147483647, %v2700_v31  ;;  %vm2070_vm4 = vcmp.lt.f32.partialorder %v2069_v36, 0.0004427343 }
0x2c58   :  { %2703 = vlog2.f32 %v2054_v32  ;;  %v2058_v37 = vadd.f32 1.0, %v2057_v34  ;;  %v2068_v45 = vmul.f32 %v2698_v29, %v2067_v35 }
0x2c59   :  { %vm2061_vm5 = vcmp.lt.f32.partialorder %v2060_v42, 0.0004427343 }
0x2c5a   :  { %v2059_v49 = vmul.f32 %v2700_v31, %v2058_v37 }
0x2c63   :  { %v2702_v40 = vpop.eup %2701 }
0x2c64   :  { %v2065_v44 = vmul.f32 0.6931472, %v2702_v40 }
0x2c65   :  { %v2704_v46 = vpop.eup %2703 }
0x2c66   :  { %v2071_v47 = vsel %vm2070_vm4, %v2068_v45, %v2065_v44  ;;  %v2056_v48 = vmul.f32 0.6931472, %v2704_v46 }
0x2c67   :  { %v2073_v6 = vadd.f32 %v2071_v47, %v2041_v4 }
0x2c68   :  { %v2062_v7 = vsel %vm2061_vm5, %v2059_v49, %v2056_v48 }
0x2c69   :  { %v2075_v51 = vsel %vm2043_vm6, %v2037_v24, %v2073_v6  ;;  %v2072_v52 = vadd.f32 %v2062_v7, %v2040_v50 }
0x2c6a   :  { %2705 = vtanh.f32 %v2075_v51 }
0x2c6b   :  { %v2074_v8 = vsel %vm2042_vm7, %v2032_v26, %v2072_v52 }
0x2c6c   :  { %2707 = vtanh.f32 %v2074_v8 }
0x2c77   :  { %v2706_v53 = vpop.eup %2705 }
0x2c78   :  { %v2079_v56 = vmul.f32 %v2706_v53, %v2037_v24 }
0x2c79   :  { %v2708_v54 = vpop.eup %2707 }
0x2c7a   :  { %v2078_v55 = vmul.f32 %v2708_v54, %v2032_v26 }
0x2c7c   :  { %2555 = vmatprep.mubr.msk.f32.mxu1 %vm2095_vm8, %v2078_v55 }
0x2c7d   :  { %2556 = vmatmul.mubr.msk.f32.vlgmr.msra.gmra.mxu1 %vm2095_vm8, %v2079_v56 }
0x2d3d   :  { %v2557_v58 = vpop.f32.mrf.mxu1 }
0x2d3e   :  { %v2174_v59 = vadd.f32 %v2557_v58, %v2225_v57 }
0x2d3f   :  { %v2168_v60 = vpop.f32.mrf.mxu1 }
0x2d40   :  { %2178 = vst.msk [vmem:[%s3276_s11 + $0x8] sm:$0xff] %vm109_vm1, %v2174_v59  ;;  %v2169_v61 = vadd.f32 %v2225_v57, %v2168_v60 }
0x2d42   :  { %2177 = vst.msk [vmem:[%s3276_s11] sm:$0xff] %vm109_vm1, %v2169_v61 }
0x2d43   :  { %2183 = vsyncpa [#allocation6], 1 }
0x2d44   :  { %2184 = vsyncpa [#allocation8], 1 }
0x2d45   :  { %2185 = vsyncpa [#allocation11], 1 }

</bundles_post_ra>
